<compile_context>
chip_gen: v5e
topology: v5e:2x2
jax: 0.10.0
libtpu: 0.0.40
codegen_flags: <defaults>
</compile_context>

<pallas_src>
import math

import jax
import jax.numpy as jnp
from jax import lax
from jax.experimental import pallas as pl
from jax.experimental.pallas import tpu as pltpu

_INV_SQRT2 = 1.0 / math.sqrt(2.0)


def _gelu_exact(x):
    # F.gelu default: 0.5 * x * (1 + erf(x / sqrt(2)))
    return 0.5 * x * (1.0 + lax.erf(x * _INV_SQRT2))


def _round_up(a, b):
    return ((a + b - 1) // b) * b


def _ffn_kernel(x_ref, w1_ref, b1_ref, w2_ref, b2_ref, wg_ref, bg_ref,
                o_ref, acc_ref):
    kf = pl.program_id(1)

    @pl.when(kf == 0)
    def _():
        acc_ref[...] = jnp.zeros_like(acc_ref)

    # x tile in its native dtype -> MXU (f32 accumulation via preferred_element_type).
    x = x_ref[...]

    # h_kf = gelu(x @ W1[:, kf] + b1[kf])  -> (tm, tkf) in f32
    h = jnp.dot(x, w1_ref[...], preferred_element_type=jnp.float32)
    h = _gelu_exact(h + b1_ref[...].astype(jnp.float32))
    # TODO(synk): dropout omitted (eval-mode identity; no RNG mask in this kernel).

    # Partial second matmul: acc += h_kf @ W2[kf, :]
    acc_ref[...] += jnp.dot(h.astype(w2_ref.dtype), w2_ref[...],
                            preferred_element_type=jnp.float32)

    @pl.when(kf == pl.num_programs(1) - 1)
    def _():
        xf = x.astype(jnp.float32)
        out = acc_ref[...] + b2_ref[...].astype(jnp.float32)
        g = jnp.dot(x, wg_ref[...], preferred_element_type=jnp.float32)
        gate = jax.nn.sigmoid(g + bg_ref[...].astype(jnp.float32))
        o_ref[...] = (gate * out + (1.0 - gate) * xf).astype(o_ref.dtype)


def position_wise_feed_forward(x, w1, b1, w2, b2, wg, bg, *,
                               tm=256, tkf=512, vmem_limit_bytes=None):
    """x: [B, S, d_model]. Weights already transposed to [in, out]."""
    B, S, d_model = x.shape
    d_ff = w1.shape[1]
    M = B * S
    x2d = x.reshape(M, d_model)

    isz = lambda a: jnp.dtype(a.dtype).itemsize

    # Row tile: multiple of the sublane pack (8 for f32, 16 for bf16), clamped for small M.
    sub = 8 if isz(x) >= 4 else 16
    tm_eff = max(sub, min(_round_up(tm, sub), _round_up(M, sub)))
    M_pad = _round_up(M, tm_eff)

    # d_ff tile: multiple of 128 lanes, clamped for small d_ff.
    tkf_eff = max(128, min(_round_up(tkf, 128), _round_up(d_ff, 128)))
    d_ff_pad = _round_up(d_ff, tkf_eff)

    if M_pad != M:
        x2d = jnp.pad(x2d, ((0, M_pad - M), (0, 0)))
    if d_ff_pad != d_ff:
        # Exact: gelu(0) == 0, so zero hidden columns contribute nothing.
        w1 = jnp.pad(w1, ((0, 0), (0, d_ff_pad - d_ff)))
        b1 = jnp.pad(b1, (0, d_ff_pad - d_ff))
        w2 = jnp.pad(w2, ((0, d_ff_pad - d_ff), (0, 0)))

    n_m = M_pad // tm_eff
    n_kf = d_ff_pad // tkf_eff
    grid = (n_m, n_kf)

    in_specs = [
        pl.BlockSpec((tm_eff, d_model), lambda i, k: (i, 0)),     # x tile (resident across kf)
        pl.BlockSpec((d_model, tkf_eff), lambda i, k: (0, k)),    # W1 slab
        pl.BlockSpec((1, tkf_eff), lambda i, k: (0, k)),          # b1 slab
        pl.BlockSpec((tkf_eff, d_model), lambda i, k: (k, 0)),    # W2 slab
        pl.BlockSpec((1, d_model), lambda i, k: (0, 0)),          # b2 (grid-invariant)
        pl.BlockSpec((d_model, d_model), lambda i, k: (0, 0)),    # Wg (grid-invariant)
        pl.BlockSpec((1, d_model), lambda i, k: (0, 0)),          # bg (grid-invariant)
    ]
    out_spec = pl.BlockSpec((tm_eff, d_model), lambda i, k: (i, 0))

    if vmem_limit_bytes is None:
        need = 2 * (                                   # default 2-deep buffering
            tm_eff * d_model * isz(x2d)                # x
            + d_model * tkf_eff * isz(w1)              # W1 slab
            + tkf_eff * isz(b1)                        # b1 slab
            + tkf_eff * d_model * isz(w2)              # W2 slab
            + d_model * isz(b2)                        # b2
            + d_model * d_model * isz(wg)              # Wg
            + d_model * isz(bg)                        # bg
            + tm_eff * d_model * isz(x2d)              # output tile
        ) + tm_eff * d_model * 4                       # f32 accumulator scratch
        vmem_limit_bytes = int(min(max(need * 3 // 2 + (4 << 20), 32 << 20),
                                   120 << 20))

    # Advisory cost estimate so XLA schedules neighbors around the custom call.
    flops = 2 * M_pad * d_model * d_ff_pad * 2 + 2 * M_pad * d_model * d_model
    transcendentals = M_pad * d_ff_pad + M_pad * d_model
    bytes_accessed = (
        M_pad * d_model * isz(x2d) * 2                         # x in, y out
        + d_model * d_ff_pad * (isz(w1) + isz(w2))             # W1, W2
        + d_model * d_model * isz(wg)                          # Wg
        + (d_ff_pad + 2 * d_model) * 4                         # biases
    )

    y2d = pl.pallas_call(
        _ffn_kernel,
        out_shape=jax.ShapeDtypeStruct((M_pad, d_model), x.dtype),
        grid_spec=pltpu.PrefetchScalarGridSpec(
            num_scalar_prefetch=0,
            grid=grid,
            in_specs=in_specs,
            out_specs=out_spec,
            scratch_shapes=[pltpu.VMEM((tm_eff, d_model), jnp.float32)],
        ),
        compiler_params=pltpu.CompilerParams(
            dimension_semantics=("parallel", "arbitrary"),
            vmem_limit_bytes=vmem_limit_bytes,
        ),
        cost_estimate=pl.CostEstimate(flops=flops,
                                      transcendentals=transcendentals,
                                      bytes_accessed=bytes_accessed),
    )(x2d, w1, b1.reshape(1, -1), w2, b2.reshape(1, -1), wg, bg.reshape(1, -1))

    return y2d[:M].reshape(B, S, d_model)


def _init_linear(key, in_features, out_features):
    """PyTorch-style uniform init; weight returned as [in, out] (pre-transposed)."""
    kw, kb = jax.random.split(key)
    bound = 1.0 / math.sqrt(in_features)
    w = jax.random.uniform(kw, (in_features, out_features), jnp.float32,
                           minval=-bound, maxval=bound)
    b = jax.random.uniform(kb, (out_features,), jnp.float32,
                           minval=-bound, maxval=bound)
    return w, b


def _reference(x, w1, b1, w2, b2, wg, bg):
    h = _gelu_exact(x @ w1 + b1)
    out = h @ w2 + b2
    gate = jax.nn.sigmoid(x @ wg + bg)
    return gate * out + (1.0 - gate) * x


if __name__ == "__main__":
    # Small shapes, module defaults for d_model / d_ff.
    B, S = 2, 8
    d_model, d_ff = 256, 1024

    key = jax.random.PRNGKey(0)
    kx, k1, k2, kg = jax.random.split(key, 4)

    x = jax.random.normal(kx, (B, S, d_model), jnp.float32)
    w1, b1 = _init_linear(k1, d_model, d_ff)      # ff1
    w2, b2 = _init_linear(k2, d_ff, d_model)      # ff2
    wg, bg = _init_linear(kg, d_model, d_model)   # chemical_gate

    y_ref = _reference(x, w1, b1, w2, b2, wg, bg)

    # Default tiling (single row tile here, d_ff split into two slabs).
    y = position_wise_feed_forward(x, w1, b1, w2, b2, wg, bg)
    y = jax.block_until_ready(y)
    assert y.shape == (B, S, d_model)
    assert jnp.allclose(y, y_ref, atol=5e-4, rtol=5e-4), "mismatch vs reference"

    # Also exercise a multi-tile M grid (n_m > 1) to cover the pipelined row axis.
    y2 = position_wise_feed_forward(x, w1, b1, w2, b2, wg, bg, tm=8)
    y2 = jax.block_until_ready(y2)
    assert jnp.allclose(y2, y_ref, atol=5e-4, rtol=5e-4), "mismatch vs reference (tm=8)"

    print("KERNEL_OK")
</pallas_src>

<mosaic_0001>
module attributes {stable_mosaic.version = 11 : i64} {
  func.func @_ffn_kernel(%arg0: i32, %arg1: i32, %arg2: memref<16x256xf32, #tpu.memory_space<vmem>>, %arg3: memref<256x512xf32, #tpu.memory_space<vmem>>, %arg4: memref<1x512xf32, #tpu.memory_space<vmem>>, %arg5: memref<512x256xf32, #tpu.memory_space<vmem>>, %arg6: memref<1x256xf32, #tpu.memory_space<vmem>>, %arg7: memref<256x256xf32, #tpu.memory_space<vmem>>, %arg8: memref<1x256xf32, #tpu.memory_space<vmem>>, %arg9: memref<16x256xf32, #tpu.memory_space<vmem>>, %arg10: memref<16x256xf32, #tpu.memory_space<vmem>>) attributes {dimension_semantics = [#tpu.dimension_semantics<parallel>, #tpu.dimension_semantics<arbitrary>], iteration_bounds = array<i64: 1, 2>, scalar_prefetch = 0 : i64, scratch_operands = 1 : i64, tpu.core_type = #tpu.core_type<tc>, window_params = [{transform_indices = @transform_0, window_bounds = array<i64: 16, 256>}, {transform_indices = @transform_1, window_bounds = array<i64: 256, 512>}, {transform_indices = @transform_2, window_bounds = array<i64: 1, 512>}, {transform_indices = @transform_3, window_bounds = array<i64: 512, 256>}, {pipeline_mode = #tpu.pipeline_mode<synchronous>, transform_indices = @transform_4, window_bounds = array<i64: 1, 256>}, {pipeline_mode = #tpu.pipeline_mode<synchronous>, transform_indices = @transform_5, window_bounds = array<i64: 256, 256>}, {pipeline_mode = #tpu.pipeline_mode<synchronous>, transform_indices = @transform_6, window_bounds = array<i64: 1, 256>}, {transform_indices = @transform_7, window_bounds = array<i64: 16, 256>}]} {
    %c0_i32 = arith.constant 0 : i32
    %0 = arith.cmpi eq, %arg1, %c0_i32 : i32
    %1 = arith.extui %0 : i1 to i32
    %c0_i32_0 = arith.constant 0 : i32
    %2 = arith.cmpi ne, %1, %c0_i32_0 : i32
    scf.if %2 {
      %cst_17 = arith.constant 0.000000e+00 : f32
      %25 = vector.broadcast %cst_17 : f32 to vector<16x256xf32>
      %c0_18 = arith.constant 0 : index
      %c0_19 = arith.constant 0 : index
      %26 = vector.load %arg10[%c0_18, %c0_19] : memref<16x256xf32, #tpu.memory_space<vmem>>, vector<16x256xf32>
      tpu.vector_store %arg10[%c0_18, %c0_19], %25 {strides = array<i32>} : memref<16x256xf32, #tpu.memory_space<vmem>>, vector<16x256xf32>,
    } else {
    }
    %c0 = arith.constant 0 : index
    %c0_1 = arith.constant 0 : index
    %3 = vector.load %arg2[%c0, %c0_1] : memref<16x256xf32, #tpu.memory_space<vmem>>, vector<16x256xf32>
    %c0_2 = arith.constant 0 : index
    %c0_3 = arith.constant 0 : index
    %4 = vector.load %arg3[%c0_2, %c0_3] : memref<256x512xf32, #tpu.memory_space<vmem>>, vector<256x512xf32>
    %cst = arith.constant dense<0.000000e+00> : vector<16x512xf32>
    %5 = tpu.matmul %3, %4, %cst {dimension_numbers = #tpu.dot_dimension_numbers<[1], [0], [0], [1], [0, 0, 1, 1], [], []>} : vector<16x256xf32>, vector<256x512xf32>, vector<16x512xf32> -> vector<16x512xf32>
    %c0_4 = arith.constant 0 : index
    %c0_5 = arith.constant 0 : index
    %6 = vector.load %arg4[%c0_4, %c0_5] : memref<1x512xf32, #tpu.memory_space<vmem>>, vector<1x512xf32>
    %7 = vector.broadcast %6 : vector<1x512xf32> to vector<16x512xf32>
    %8 = arith.addf %5, %7 : vector<16x512xf32>
    %cst_6 = arith.constant 5.000000e-01 : f32
    %9 = vector.broadcast %cst_6 : f32 to vector<16x512xf32>
    %10 = arith.mulf %9, %8 : vector<16x512xf32>
    %cst_7 = arith.constant 0.707106769 : f32
    %11 = vector.broadcast %cst_7 : f32 to vector<16x512xf32>
    %12 = arith.mulf %8, %11 : vector<16x512xf32>
    %13 = math.erf %12 : vector<16x512xf32>
    %cst_8 = arith.constant 1.000000e+00 : f32
    %14 = vector.broadcast %cst_8 : f32 to vector<16x512xf32>
    %15 = arith.addf %14, %13 : vector<16x512xf32>
    %16 = arith.mulf %10, %15 : vector<16x512xf32>
    %c0_9 = arith.constant 0 : index
    %c0_10 = arith.constant 0 : index
    %17 = vector.load %arg10[%c0_9, %c0_10] : memref<16x256xf32, #tpu.memory_space<vmem>>, vector<16x256xf32>
    %c0_11 = arith.constant 0 : index
    %c0_12 = arith.constant 0 : index
    %18 = vector.load %arg5[%c0_11, %c0_12] : memref<512x256xf32, #tpu.memory_space<vmem>>, vector<512x256xf32>
    %cst_13 = arith.constant dense<0.000000e+00> : vector<16x256xf32>
    %19 = tpu.matmul %16, %18, %cst_13 {dimension_numbers = #tpu.dot_dimension_numbers<[1], [0], [0], [1], [0, 0, 1, 1], [], []>} : vector<16x512xf32>, vector<512x256xf32>, vector<16x256xf32> -> vector<16x256xf32>
    %20 = arith.addf %17, %19 : vector<16x256xf32>
    %c0_14 = arith.constant 0 : index
    %c0_15 = arith.constant 0 : index
    %21 = vector.load %arg10[%c0_14, %c0_15] : memref<16x256xf32, #tpu.memory_space<vmem>>, vector<16x256xf32>
    tpu.vector_store %arg10[%c0_14, %c0_15], %20 {strides = array<i32>} : memref<16x256xf32, #tpu.memory_space<vmem>>, vector<16x256xf32>,
    %c1_i32 = arith.constant 1 : i32
    %22 = arith.cmpi eq, %arg1, %c1_i32 : i32
    %23 = arith.extui %22 : i1 to i32
    %c0_i32_16 = arith.constant 0 : i32
    %24 = arith.cmpi ne, %23, %c0_i32_16 : i32
    scf.if %24 {
      %c0_17 = arith.constant 0 : index
      %c0_18 = arith.constant 0 : index
      %25 = vector.load %arg10[%c0_17, %c0_18] : memref<16x256xf32, #tpu.memory_space<vmem>>, vector<16x256xf32>
      %c0_19 = arith.constant 0 : index
      %c0_20 = arith.constant 0 : index
      %26 = vector.load %arg6[%c0_19, %c0_20] : memref<1x256xf32, #tpu.memory_space<vmem>>, vector<1x256xf32>
      %27 = vector.broadcast %26 : vector<1x256xf32> to vector<16x256xf32>
      %28 = arith.addf %25, %27 : vector<16x256xf32>
      %c0_21 = arith.constant 0 : index
      %c0_22 = arith.constant 0 : index
      %29 = vector.load %arg7[%c0_21, %c0_22] : memref<256x256xf32, #tpu.memory_space<vmem>>, vector<256x256xf32>
      %cst_23 = arith.constant dense<0.000000e+00> : vector<16x256xf32>
      %30 = tpu.matmul %3, %29, %cst_23 {dimension_numbers = #tpu.dot_dimension_numbers<[1], [0], [0], [1], [0, 0, 1, 1], [], []>} : vector<16x256xf32>, vector<256x256xf32>, vector<16x256xf32> -> vector<16x256xf32>
      %c0_24 = arith.constant 0 : index
      %c0_25 = arith.constant 0 : index
      %31 = vector.load %arg8[%c0_24, %c0_25] : memref<1x256xf32, #tpu.memory_space<vmem>>, vector<1x256xf32>
      %32 = vector.broadcast %31 : vector<1x256xf32> to vector<16x256xf32>
      %33 = arith.addf %30, %32 : vector<16x256xf32>
      %34 = arith.negf %33 : vector<16x256xf32>
      %35 = math.exp %34 : vector<16x256xf32>
      %cst_26 = arith.constant 1.000000e+00 : f32
      %36 = vector.broadcast %cst_26 : f32 to vector<16x256xf32>
      %37 = arith.addf %36, %35 : vector<16x256xf32>
      %38 = arith.divf %36, %37 : vector<16x256xf32>
      %39 = arith.mulf %38, %28 : vector<16x256xf32>
      %cst_27 = arith.constant 1.000000e+00 : f32
      %40 = vector.broadcast %cst_27 : f32 to vector<16x256xf32>
      %41 = arith.subf %40, %38 : vector<16x256xf32>
      %42 = arith.mulf %41, %3 : vector<16x256xf32>
      %43 = arith.addf %39, %42 : vector<16x256xf32>
      %c0_28 = arith.constant 0 : index
      %c0_29 = arith.constant 0 : index
      %44 = vector.load %arg9[%c0_28, %c0_29] : memref<16x256xf32, #tpu.memory_space<vmem>>, vector<16x256xf32>
      tpu.vector_store %arg9[%c0_28, %c0_29], %43 {strides = array<i32>} : memref<16x256xf32, #tpu.memory_space<vmem>>, vector<16x256xf32>,
    } else {
    }
    return
  }
  func.func @transform_0(%arg0: i32, %arg1: i32) -> (i32, i32) {
    %c0_i32 = arith.constant 0 : i32
    %c0_i32_0 = arith.constant 0 : i32
    return %arg0, %c0_i32 : i32, i32
  }
  func.func @transform_1(%arg0: i32, %arg1: i32) -> (i32, i32) {
    %c0_i32 = arith.constant 0 : i32
    %c0_i32_0 = arith.constant 0 : i32
    return %c0_i32, %arg1 : i32, i32
  }
  func.func @transform_2(%arg0: i32, %arg1: i32) -> (i32, i32) {
    %c0_i32 = arith.constant 0 : i32
    %c0_i32_0 = arith.constant 0 : i32
    return %c0_i32, %arg1 : i32, i32
  }
  func.func @transform_3(%arg0: i32, %arg1: i32) -> (i32, i32) {
    %c0_i32 = arith.constant 0 : i32
    %c0_i32_0 = arith.constant 0 : i32
    return %arg1, %c0_i32 : i32, i32
  }
  func.func @transform_4(%arg0: i32, %arg1: i32) -> (i32, i32) {
    %c0_i32 = arith.constant 0 : i32
    %c0_i32_0 = arith.constant 0 : i32
    %c0_i32_1 = arith.constant 0 : i32
    return %c0_i32, %c0_i32_0 : i32, i32
  }
  func.func @transform_5(%arg0: i32, %arg1: i32) -> (i32, i32) {
    %c0_i32 = arith.constant 0 : i32
    %c0_i32_0 = arith.constant 0 : i32
    %c0_i32_1 = arith.constant 0 : i32
    return %c0_i32, %c0_i32_0 : i32, i32
  }
  func.func @transform_6(%arg0: i32, %arg1: i32) -> (i32, i32) {
    %c0_i32 = arith.constant 0 : i32
    %c0_i32_0 = arith.constant 0 : i32
    %c0_i32_1 = arith.constant 0 : i32
    return %c0_i32, %c0_i32_0 : i32, i32
  }
  func.func @transform_7(%arg0: i32, %arg1: i32) -> (i32, i32) {
    %c0_i32 = arith.constant 0 : i32
    %c0_i32_0 = arith.constant 0 : i32
    return %arg0, %c0_i32 : i32, i32
  }
}

</mosaic_0001>

<bundles_post_ra>
// kernel: tpu_custom_call.1
= control target key start
LH: loop header
LB: loop body
LE: loop exit
PB: predicated region body
PF: predicated region fallthrough
CT: control target
= control target key end

     0   :  { %s3158_s0 = inlined_call_operand.hbm [shape: f32[16,256], index: 0, kind: input, shape index: {}]   ;;  %s3159_s1 = inlined_call_operand.hbm [shape: f32[256,1024], index: 1, kind: input, shape index: {}]   ;;  %s3160_s2 = inlined_call_operand.hbm [shape: f32[1,1024], index: 2, kind: input, shape index: {}]   ;;  %s3161_s3 = inlined_call_operand.hbm [shape: f32[1024,256], index: 3, kind: input, shape index: {}]   ;;  %s3162_s4 = inlined_call_operand.vmem [shape: f32[1,256], index: 4, kind: input, shape index: {}]   ;;  %s3163_s5 = inlined_call_operand.hbm [shape: f32[256,256], index: 5, kind: input, shape index: {}]   ;;  %s3164_s6 = inlined_call_operand.vmem [shape: f32[1,256], index: 6, kind: input, shape index: {}]   ;;  %s3165_s7 = inlined_call_operand.hbm [shape: f32[16,256], index: 7, kind: output, shape index: {}]  }
   0x1   :  { %3173 = sst [smem:[#allocation21_spill]] %s3158_s0 }
   0x2   :  { %3174 = sst [smem:[#allocation22_spill]] %s3159_s1 }
   0x3   :  { %3175 = sst [smem:[#allocation23_spill]] %s3162_s4 }
   0x4   :  { %3176 = sst [smem:[#allocation24_spill]] %s3163_s5 }
   0x5   :  { %3177 = sst [smem:[#allocation25_spill]] %s3165_s7 }
   0x6   :  { %12 = vsyncpa [#allocation4], 0 }
   0x7   :  { %13 = vsyncpa [#allocation7], 0 }
   0x8   :  { %15 = vsyncpa [#allocation7 + $0x1], 0 }
   0x9   :  { %16 = vsyncpa [#allocation10], 0 }
   0xa   :  { %18 = vsyncpa [#allocation10 + $0x1], 0 }
   0xb   :  { %19 = vsyncpa [#allocation5], 0  ;;  %s2329_s24 = smov 0   ;;  %s2331_s25 = smov 0  }
   0xc   :  { %s2333_s26 = smov 0   ;;  %s2335_s27 = smov 0  }
   0xd   :  { %s2337_s28 = smov 0   ;;  %s2339_s29 = smov 0  }
   0xe LB: > { %3178 = sst [smem:[#allocation18_spill]] %s2264_s26  ;;  %s2358_s30 = sadd.s32 4294967295, %s2276_s29   ;;  %s2276_s29 = sphi %s2339_s29, %s25_s29   ;;  %s2272_s28 = sphi %s2337_s28, %s3208_s28   ;;  %s2268_s27 = sphi %s2335_s27, %s3207_s27   ;;  %s2264_s26 = sphi %s2333_s26, %s3203_s26   ;;  %s2260_s25 = sphi %s2331_s25, %s3206_s25   ;;  %s2256_s24 = sphi %s2329_s24, %s3205_s24  }
   0xf   : > { %p83_p0 = scmp.ne.s32.totalorder %s2260_s25, %s2256_s24  ;;  %p84_p1 = scmp.eq.s32.totalorder %s2358_s30, 0 }
  0x10   : > { %p1859_p2 = scmp.ge.s32.totalorder %s2276_s29, 1  ;;  %p235_p3 = scmp.lt.s32.totalorder %s2276_s29, 3 }
  0x11   : > { %p2366_p4 = por %p84_p1, %p83_p0  ;;  %s3181_s5 = sld [smem:[#allocation24_spill]] }
  0x12   : > { %p2370_p5 = pnand %p1859_p2, %p235_p3  ;;  %s2278_s13 = smov [#allocation11]  }
  0x13   : > { %s269_s14 = sshll.u32 %s2278_s13, 4  ;;  %s3166_s16 = smov 256   ;;  %s270_s14 = int_to_ptr.vmem [resolvable:$true] %s269_s14 }
  0x14   : > { %p1917_p6 = pneg %p2370_p5  ;;  %s3168_s17 = smov 16  }
  0x15   : > { %s34_s18 = sadd.s32 1, %s2272_s28  ;;  %s70_s19 = sadd.s32 1, %s2264_s26 }
  0x16   : > { %p2381_p7 = pnand %p1917_p6, %p84_p1  ;;  %p35_p8 = scmp.ge.s32.totalorder %s34_s18, 2 }
  0x17   : > { %s267_s12 = sshll.u32 %s3181_s5, 4  ;;  %p77_p9 = scmp.ne.s32.totalorder %s2264_s26, %s2260_s25  ;;  %s268_s12 = int_to_ptr.hbm [resolvable:$true] %s267_s12 }
  0x18   : > { %1923 = dma.hbm_to_vmem [thread:$0]  (!%p2381_p7), %s268_s12, 8192, %s270_s14, [#allocation10], %s3166_s16, %s3166_s16, %s3168_s17  }
  0x19   : > { %p78_p10 = scmp.eq.s32.totalorder %s2276_s29, 0  ;;  %s3210_s18 = smov (%p35_p8, %s34_s18), 0 }
  0x1a   : > { %3183 = sst [smem:[#allocation19_spill]] %s3210_s18  ;;  %p1936_p12 = scmp.lt.s32.totalorder %s2276_s29, 2 }
  0x1b   : > { %p2397_p11 = por %p78_p10, %p77_p9  ;;  %s67_s21 = ssub.s32 %s2272_s28, %s3210_s18 }
  0x1c   : > { %s3172_s22 = sand.u32 1, %s2276_s29   ;;  %p68_p13 = scmp.eq.s32.totalorder %s67_s21, 0 }
  0x1d   : > { %s288_s23 = sand.u32 1, %s2264_s26   ;;  %s1896_s24 = sshll.u32 %s2272_s28, 5 }
  0x1e   : > { %s2408_s10 = scalar_select %p68_p13, %s2264_s26, %s70_s19  }
  0x1f   : > { %s2410_s11 = sshll.u32 %s288_s23, 10  ;;  %s3186_s1 = sld [smem:[#allocation22_spill]] }
  0x20   : > { %3185 = sst [smem:[#allocation20_spill]] %s2408_s10  ;;  %s290_s17 = scalar_lea.vmem [#allocation6], %s2410_s11 }
  0x21   : > { %s298_s5 = sshll.u32 %s290_s17, 4  ;;  %p2420_p0 = pnand %p1936_p12, %p2397_p11  ;;  %s299_s5 = int_to_ptr.vmem [resolvable:$true] %s298_s5 }
  0x22   : > { %s287_s19 = scalar_lea.sflag [#allocation7], %s3172_s22  ;;  %s2281_s18 = smov 1024  }
  0x23   : > { %s2282_s12 = smov 512   ;;  %s2283_s13 = smov 32  }
  0x24   : > { %s3188_s0 = sld [smem:[#allocation21_spill]]  ;;  %s1866_s20 = sshll.u32 %s288_s23, 2 }
  0x25   : > { %s295_s14 = scalar_lea.hbm %s3186_s1, %s1896_s24  ;;  %s2284_s1 = smov [#allocation3]  }
  0x26   : > { %s296_s16 = sshll.u32 %s295_s14, 4  ;;  %s252_s10 = sshll.u32 %s2284_s1, 4  ;;  %s297_s16 = int_to_ptr.hbm [resolvable:$true] %s296_s16  ;;  %s253_s10 = int_to_ptr.vmem [resolvable:$true] %s252_s10 }
  0x27   : > { %1927 = dma.hbm_to_vmem [thread:$0]  (!%p2420_p0), %s297_s16, 16384, %s299_s5, %s287_s19, %s2281_s18, %s2282_s12, %s2283_s13  }
  0x28   : > { %s1867_s26 = sshll.u32 %s2272_s28, 2  ;;  %s3189_s22 = smov 16  }
  0x29   : > { %s3190_s7 = smov 256   ;;  %s316_s16 = scalar_lea.hbm %s3160_s2, %s1867_s26 }
  0x2a   : > { %s250_s17 = sshll.u32 %s3188_s0, 4  ;;  %s312_s18 = scalar_lea.vmem [#allocation8], %s1866_s20  ;;  %s251_s17 = int_to_ptr.hbm [resolvable:$true] %s250_s17 }
  0x2b   : > { %1920 = dma.hbm_to_vmem [thread:$0]  (!%p2381_p7), %s251_s17, 512, %s253_s10, [#allocation4], %s3190_s7, %s3190_s7, %s3189_s22  }
  0x2c   : > { %s320_s12 = sshll.u32 %s312_s18, 4  ;;  %s318_s13 = sshll.u32 %s316_s16, 4  ;;  %s321_s12 = int_to_ptr.vmem [resolvable:$true] %s320_s12  ;;  %s319_s13 = int_to_ptr.hbm [resolvable:$true] %s318_s13 }
  0x2d   : > { %1930 = dma.hbm_to_vmem [thread:$0]  (!%p2420_p0), %s319_s13, 64, %s321_s12, %s287_s19  }
  0x2e   : > { %s1898_s1 = sshll.u32 %s2272_s28, 10  ;;  %s331_s14 = scalar_lea.vmem [#allocation9], %s2410_s11 }
  0x2f   : > { %s337_s24 = scalar_lea.hbm %s3161_s3, %s1898_s1  ;;  %s340_s0 = sshll.u32 %s331_s14, 4  ;;  %s341_s0 = int_to_ptr.vmem [resolvable:$true] %s340_s0 }
  0x30   : > { %s338_s10 = sshll.u32 %s337_s24, 4  ;;  %s3191_s4 = sand.u32 1, %s2276_s29   ;;  %s339_s10 = int_to_ptr.hbm [resolvable:$true] %s338_s10 }
  0x31   : > { %s328_s17 = scalar_lea.sflag [#allocation10], %s3191_s4  ;;  %352 = sbr.rel (%p2370_p5) target bundleno = 734 (0x2de), region = 48 }
  0x32   : > { %1933 = dma.hbm_to_vmem [thread:$0]  (!%p2420_p0), %s339_s10, 16384, %s341_s0, %s328_s17, %s3190_s7, %s3190_s7, %s3189_s22  }
  0x36   : > { %2235 = dma.done.wait (%p84_p1), [#allocation4], 512  }
  0x37   : > { %2237 = vsyncadd (%p84_p1), [#allocation4], 4294966784  ;;  %s359_s26 = sand.u32 1, %s2358_s30   ;;  %s361_s11 = sand.u32 1, %s2260_s25  }
  0x38   : > { %s1874_s19 = sshll.u32 %s361_s11, 10  ;;  %s360_s21 = scalar_lea.sflag [#allocation7], %s359_s26 }
  0x39   : > { %s2462_s20 = scalar_lea.vmem [#allocation6], %s1874_s19 }
  0x3a   : > { %2239 = dma.done.wait (%p2366_p4), %s360_s21, 16448  }
  0x3b   : > { %2241 = vsyncadd (%p2366_p4), %s360_s21, 4294950848  ;;  %s2468_s0 = sshll.u32 %s361_s11, 2  ;;  %s380_s9 = scalar_lea.sflag [#allocation10], %s359_s26 }
  0x3c   : > { %s373_s7 = scalar_lea.vmem [#allocation8], %s2468_s0  ;;  %s2471_s22 = scalar_lea.vmem [#allocation9], %s1874_s19 }
  0x3d   : > { %2243 = dma.done.wait (%p2366_p4), %s380_s9, 16384  }
  0x3e   : > { %2245 = vsyncadd (%p2366_p4), %s380_s9, 4294950912 }
  0x3f   : > { %2247 = dma.done.wait (%p84_p1), [#allocation10], 8192  }
  0x40   : > { %2249 = vsyncadd (%p84_p1), [#allocation10], 4294959104  ;;  %p1878_p2 = scmp.ne.s32.totalorder %s2268_s27, 0 }
  0x42   : > { %433 = sbr.rel (%p1878_p2) target bundleno = 76 (0x4c), region = 72 }
  0x47   : > { %v2285_v0 = vmov 0.0  }
  0x48   : > { %434 = vst [vmem:[#allocation2 + $0x10] sm:$0xff] %v2285_v0 }
  0x49   : > { %435 = vst [vmem:[#allocation2] sm:$0xff] %v2285_v0 }
  0x4a   : > { %436 = vst [vmem:[#allocation2 + $0x18] sm:$0xff] %v2285_v0 }
  0x4b   : > { %437 = vst [vmem:[#allocation2 + $0x8] sm:$0xff] %v2285_v0 }
  0x4c PF: > { %v502_v1 = vld [vmem:[%s2462_s20 + $0x1e0] sm:$0xff]  ;;  %v503_v2 = vld [vmem:[%s2462_s20 + $0x1e8] sm:$0xff]  ;;  %v504_v0 = vld [vmem:[%s2462_s20 + $0x1f0] sm:$0xff]  ;;  %p1887_p1 = scmp.ne.s32.totalorder %s2268_s27, 1 }
  0x4d   : > { %v498_v3 = vld [vmem:[%s2462_s20 + $0x1c0] sm:$0xff]  ;;  %580 = vmatpush.msra.mxu0 %v502_v1  ;;  %626 = vmatpush.msra.mxu2 %v503_v2  ;;  %v499_v5 = vld [vmem:[%s2462_s20 + $0x1c8] sm:$0xff]  ;;  %v505_v1 = vld [vmem:[%s2462_s20 + $0x1f8] sm:$0xff]  ;;  %s3200_s18 = sld [smem:[#allocation23_spill]] (!%p1887_p1) }
  0x4e   : > { %v566_v4 = vld [vmem:[%s2462_s20 + $0x3e0] sm:$0xff]  ;;  %v567_v6 = vld [vmem:[%s2462_s20 + $0x3e8] sm:$0xff] }
  0x4f   : > { %603 = vmatpush.msra.mxu1 %v566_v4  ;;  %649 = vmatpush.msra.mxu3 %v567_v6  ;;  %v494_v7 = vld [vmem:[%s2462_s20 + $0x1a0] sm:$0xff]  ;;  %v495_v9 = vld [vmem:[%s2462_s20 + $0x1a8] sm:$0xff]  ;;  %v568_v6 = vld [vmem:[%s2462_s20 + $0x3f0] sm:$0xff] }
  0x50   : > { %v562_v8 = vld [vmem:[%s2462_s20 + $0x3c0] sm:$0xff]  ;;  %581 = vmatpush.msra.mxu0 %v498_v3  ;;  %627 = vmatpush.msra.mxu2 %v499_v5  ;;  %v563_v10 = vld [vmem:[%s2462_s20 + $0x3c8] sm:$0xff]  ;;  %v500_v5 = vld [vmem:[%s2462_s20 + $0x1d0] sm:$0xff] }
  0x51   : > { %v558_v11 = vld [vmem:[%s2462_s20 + $0x3a0] sm:$0xff]  ;;  %604 = vmatpush.msra.mxu1 %v562_v8  ;;  %650 = vmatpush.msra.mxu3 %v563_v10  ;;  %v491_v13 = vld [vmem:[%s2462_s20 + $0x188] sm:$0xff]  ;;  %v569_v8 = vld [vmem:[%s2462_s20 + $0x3f8] sm:$0xff] }
  0x52   : > { %v490_v12 = vld [vmem:[%s2462_s20 + $0x180] sm:$0xff]  ;;  %v559_v14 = vld [vmem:[%s2462_s20 + $0x3a8] sm:$0xff]  ;;  %582 = vmatpush.msra.mxu0 %v494_v7  ;;  %628 = vmatpush.msra.mxu2 %v495_v9  ;;  %v501_v7 = vld [vmem:[%s2462_s20 + $0x1d8] sm:$0xff] }
  0x53   : > { %v554_v15 = vld [vmem:[%s2462_s20 + $0x380] sm:$0xff]  ;;  %v555_v16 = vld [vmem:[%s2462_s20 + $0x388] sm:$0xff]  ;;  %605 = vmatpush.msra.mxu1 %v558_v11  ;;  %651 = vmatpush.msra.mxu3 %v559_v14  ;;  %v496_v9 = vld [vmem:[%s2462_s20 + $0x1b0] sm:$0xff] }
  0x54   : > { %v486_v17 = vld [vmem:[%s2462_s20 + $0x160] sm:$0xff]  ;;  %v487_v18 = vld [vmem:[%s2462_s20 + $0x168] sm:$0xff]  ;;  %583 = vmatpush.msra.mxu0 %v490_v12  ;;  %629 = vmatpush.msra.mxu2 %v491_v13  ;;  %v564_v10 = vld [vmem:[%s2462_s20 + $0x3d0] sm:$0xff] }
  0x55   : > { %v550_v19 = vld [vmem:[%s2462_s20 + $0x360] sm:$0xff]  ;;  %v551_v20 = vld [vmem:[%s2462_s20 + $0x368] sm:$0xff]  ;;  %606 = vmatpush.msra.mxu1 %v554_v15  ;;  %652 = vmatpush.msra.mxu3 %v555_v16  ;;  %v497_v11 = vld [vmem:[%s2462_s20 + $0x1b8] sm:$0xff] }
  0x56   : > { %v482_v21 = vld [vmem:[%s2462_s20 + $0x140] sm:$0xff]  ;;  %v483_v22 = vld [vmem:[%s2462_s20 + $0x148] sm:$0xff]  ;;  %584 = vmatpush.msra.mxu0 %v486_v17  ;;  %630 = vmatpush.msra.mxu2 %v487_v18  ;;  %v565_v12 = vld [vmem:[%s2462_s20 + $0x3d8] sm:$0xff] }
  0x57   : > { %v546_v23 = vld [vmem:[%s2462_s20 + $0x340] sm:$0xff]  ;;  %v547_v24 = vld [vmem:[%s2462_s20 + $0x348] sm:$0xff]  ;;  %607 = vmatpush.msra.mxu1 %v550_v19  ;;  %653 = vmatpush.msra.mxu3 %v551_v20  ;;  %v492_v13 = vld [vmem:[%s2462_s20 + $0x190] sm:$0xff] }
  0x58   : > { %v478_v25 = vld [vmem:[%s2462_s20 + $0x120] sm:$0xff]  ;;  %v479_v26 = vld [vmem:[%s2462_s20 + $0x128] sm:$0xff]  ;;  %585 = vmatpush.msra.mxu0 %v482_v21  ;;  %631 = vmatpush.msra.mxu2 %v483_v22  ;;  %v560_v14 = vld [vmem:[%s2462_s20 + $0x3b0] sm:$0xff] }
  0x59   : > { %v542_v27 = vld [vmem:[%s2462_s20 + $0x320] sm:$0xff]  ;;  %v543_v28 = vld [vmem:[%s2462_s20 + $0x328] sm:$0xff]  ;;  %608 = vmatpush.msra.mxu1 %v546_v23  ;;  %654 = vmatpush.msra.mxu3 %v547_v24  ;;  %v493_v15 = vld [vmem:[%s2462_s20 + $0x198] sm:$0xff] }
  0x5a   : > { %v474_v29 = vld [vmem:[%s2462_s20 + $0x100] sm:$0xff]  ;;  %v475_v30 = vld [vmem:[%s2462_s20 + $0x108] sm:$0xff]  ;;  %586 = vmatpush.msra.mxu0 %v478_v25  ;;  %632 = vmatpush.msra.mxu2 %v479_v26  ;;  %v561_v16 = vld [vmem:[%s2462_s20 + $0x3b8] sm:$0xff] }
  0x5b   : > { %v538_v31 = vld [vmem:[%s2462_s20 + $0x300] sm:$0xff]  ;;  %v539_v32 = vld [vmem:[%s2462_s20 + $0x308] sm:$0xff]  ;;  %609 = vmatpush.msra.mxu1 %v542_v27  ;;  %655 = vmatpush.msra.mxu3 %v543_v28  ;;  %v2568_v17 = vld [vmem:[#allocation3 + $0x10] sm:$0xff] }
  0x5c   : > { %v470_v33 = vld [vmem:[%s2462_s20 + $0xe0] sm:$0xff]  ;;  %v471_v34 = vld [vmem:[%s2462_s20 + $0xe8] sm:$0xff]  ;;  %587 = vmatpush.msra.mxu0 %v474_v29  ;;  %633 = vmatpush.msra.mxu2 %v475_v30  ;;  %v488_v18 = vld [vmem:[%s2462_s20 + $0x170] sm:$0xff] }
  0x5d   : > { %v534_v35 = vld [vmem:[%s2462_s20 + $0x2e0] sm:$0xff]  ;;  %v535_v36 = vld [vmem:[%s2462_s20 + $0x2e8] sm:$0xff]  ;;  %610 = vmatpush.msra.mxu1 %v538_v31  ;;  %656 = vmatpush.msra.mxu3 %v539_v32  ;;  %v556_v19 = vld [vmem:[%s2462_s20 + $0x390] sm:$0xff] }
  0x5e   : > { %v466_v37 = vld [vmem:[%s2462_s20 + $0xc0] sm:$0xff]  ;;  %v467_v38 = vld [vmem:[%s2462_s20 + $0xc8] sm:$0xff]  ;;  %588 = vmatpush.msra.mxu0 %v470_v33  ;;  %634 = vmatpush.msra.mxu2 %v471_v34  ;;  %v489_v20 = vld [vmem:[%s2462_s20 + $0x178] sm:$0xff] }
  0x5f   : > { %v530_v39 = vld [vmem:[%s2462_s20 + $0x2c0] sm:$0xff]  ;;  %v531_v40 = vld [vmem:[%s2462_s20 + $0x2c8] sm:$0xff]  ;;  %611 = vmatpush.msra.mxu1 %v534_v35  ;;  %657 = vmatpush.msra.mxu3 %v535_v36  ;;  %v557_v21 = vld [vmem:[%s2462_s20 + $0x398] sm:$0xff] }
  0x60   : > { %v462_v41 = vld [vmem:[%s2462_s20 + $0xa0] sm:$0xff]  ;;  %v463_v42 = vld [vmem:[%s2462_s20 + $0xa8] sm:$0xff]  ;;  %589 = vmatpush.msra.mxu0 %v466_v37  ;;  %635 = vmatpush.msra.mxu2 %v467_v38  ;;  %v2576_v22 = vld [vmem:[#allocation3 + $0x18] sm:$0xff] }
  0x61   : > { %v526_v43 = vld [vmem:[%s2462_s20 + $0x2a0] sm:$0xff]  ;;  %v527_v44 = vld [vmem:[%s2462_s20 + $0x2a8] sm:$0xff]  ;;  %612 = vmatpush.msra.mxu1 %v530_v39  ;;  %658 = vmatpush.msra.mxu3 %v531_v40  ;;  %v484_v23 = vld [vmem:[%s2462_s20 + $0x150] sm:$0xff] }
  0x62   : > { %v458_v45 = vld [vmem:[%s2462_s20 + $0x80] sm:$0xff]  ;;  %v459_v46 = vld [vmem:[%s2462_s20 + $0x88] sm:$0xff]  ;;  %590 = vmatpush.msra.mxu0 %v462_v41  ;;  %636 = vmatpush.msra.mxu2 %v463_v42  ;;  %v552_v24 = vld [vmem:[%s2462_s20 + $0x370] sm:$0xff] }
  0x63   : > { %v522_v47 = vld [vmem:[%s2462_s20 + $0x280] sm:$0xff]  ;;  %v523_v48 = vld [vmem:[%s2462_s20 + $0x288] sm:$0xff]  ;;  %613 = vmatpush.msra.mxu1 %v526_v43  ;;  %659 = vmatpush.msra.mxu3 %v527_v44  ;;  %v485_v25 = vld [vmem:[%s2462_s20 + $0x158] sm:$0xff] }
  0x64   : > { %v454_v49 = vld [vmem:[%s2462_s20 + $0x60] sm:$0xff]  ;;  %v455_v50 = vld [vmem:[%s2462_s20 + $0x68] sm:$0xff]  ;;  %591 = vmatpush.msra.mxu0 %v458_v45  ;;  %637 = vmatpush.msra.mxu2 %v459_v46  ;;  %v553_v26 = vld [vmem:[%s2462_s20 + $0x378] sm:$0xff] }
  0x65   : > { %v518_v51 = vld [vmem:[%s2462_s20 + $0x260] sm:$0xff]  ;;  %v519_v52 = vld [vmem:[%s2462_s20 + $0x268] sm:$0xff]  ;;  %614 = vmatpush.msra.mxu1 %v522_v47  ;;  %660 = vmatpush.msra.mxu3 %v523_v48  ;;  %v480_v27 = vld [vmem:[%s2462_s20 + $0x130] sm:$0xff] }
  0x66   : > { %v450_v53 = vld [vmem:[%s2462_s20 + $0x40] sm:$0xff]  ;;  %v451_v54 = vld [vmem:[%s2462_s20 + $0x48] sm:$0xff]  ;;  %592 = vmatpush.msra.mxu0 %v454_v49  ;;  %638 = vmatpush.msra.mxu2 %v455_v50  ;;  %v548_v28 = vld [vmem:[%s2462_s20 + $0x350] sm:$0xff] }
  0x67   : > { %v514_v55 = vld [vmem:[%s2462_s20 + $0x240] sm:$0xff]  ;;  %v515_v56 = vld [vmem:[%s2462_s20 + $0x248] sm:$0xff]  ;;  %615 = vmatpush.msra.mxu1 %v518_v51  ;;  %661 = vmatpush.msra.mxu3 %v519_v52  ;;  %v481_v29 = vld [vmem:[%s2462_s20 + $0x138] sm:$0xff] }
  0x68   : > { %v446_v57 = vld [vmem:[%s2462_s20 + $0x20] sm:$0xff]  ;;  %v447_v58 = vld [vmem:[%s2462_s20 + $0x28] sm:$0xff]  ;;  %593 = vmatpush.msra.mxu0 %v450_v53  ;;  %639 = vmatpush.msra.mxu2 %v451_v54  ;;  %v549_v30 = vld [vmem:[%s2462_s20 + $0x358] sm:$0xff] }
  0x69   : > { %v510_v59 = vld [vmem:[%s2462_s20 + $0x220] sm:$0xff]  ;;  %v511_v60 = vld [vmem:[%s2462_s20 + $0x228] sm:$0xff]  ;;  %616 = vmatpush.msra.mxu1 %v514_v55  ;;  %662 = vmatpush.msra.mxu3 %v515_v56  ;;  %v476_v31 = vld [vmem:[%s2462_s20 + $0x110] sm:$0xff] }
  0x6a   : > { %v442_v61 = vld [vmem:[%s2462_s20] sm:$0xff]  ;;  %v443_v62 = vld [vmem:[%s2462_s20 + $0x8] sm:$0xff]  ;;  %594 = vmatpush.msra.mxu0 %v446_v57  ;;  %640 = vmatpush.msra.mxu2 %v447_v58  ;;  %v544_v32 = vld [vmem:[%s2462_s20 + $0x330] sm:$0xff] }
  0x6b   : > { %v2544_v63 = vld [vmem:[#allocation3] sm:$0xff]  ;;  %617 = vmatpush.msra.mxu1 %v510_v59  ;;  %663 = vmatpush.msra.mxu3 %v511_v60  ;;  %v507_v3 = vld [vmem:[%s2462_s20 + $0x208] sm:$0xff]  ;;  %v477_v33 = vld [vmem:[%s2462_s20 + $0x118] sm:$0xff] }
  0x6c   : > { %595 = vmatpush.msra.mxu0 %v442_v61  ;;  %641 = vmatpush.msra.mxu2 %v443_v62  ;;  %v506_v2 = vld [vmem:[%s2462_s20 + $0x200] sm:$0xff]  ;;  %v2552_v4 = vld [vmem:[#allocation3 + $0x8] sm:$0xff]  ;;  %v545_v34 = vld [vmem:[%s2462_s20 + $0x338] sm:$0xff] }
  0x6d   : > { %596 = vmatmul.f32.vlgmr.msra.gmra.mxu0 %v2544_v63  ;;  %642 = vmatmul.f32.vlgmr.msra.gmra.mxu2 %v2544_v63  ;;  %v472_v35 = vld [vmem:[%s2462_s20 + $0xf0] sm:$0xff]  ;;  %v473_v37 = vld [vmem:[%s2462_s20 + $0xf8] sm:$0xff] }
  0x6e   : > { %672 = vmatpush.msrb.mxu0 %v504_v0  ;;  %718 = vmatpush.msrb.mxu2 %v505_v1  ;;  %v540_v36 = vld [vmem:[%s2462_s20 + $0x310] sm:$0xff]  ;;  %v541_v38 = vld [vmem:[%s2462_s20 + $0x318] sm:$0xff] }
  0x6f   : > { %618 = vmatpush.msra.mxu1 %v506_v2  ;;  %664 = vmatpush.msra.mxu3 %v507_v3  ;;  %v468_v39 = vld [vmem:[%s2462_s20 + $0xd0] sm:$0xff]  ;;  %v469_v41 = vld [vmem:[%s2462_s20 + $0xd8] sm:$0xff] }
  0x70   : > { %619 = vmatmul.f32.vlgmr.msra.gmra.mxu1 %v2552_v4  ;;  %665 = vmatmul.f32.vlgmr.msra.gmra.mxu3 %v2552_v4  ;;  %v536_v40 = vld [vmem:[%s2462_s20 + $0x2f0] sm:$0xff]  ;;  %v537_v42 = vld [vmem:[%s2462_s20 + $0x2f8] sm:$0xff] }
  0x71   : > { %673 = vmatpush.msrb.mxu0 %v500_v5  ;;  %695 = vmatpush.msrb.mxu1 %v568_v6  ;;  %v464_v43 = vld [vmem:[%s2462_s20 + $0xb0] sm:$0xff]  ;;  %v465_v45 = vld [vmem:[%s2462_s20 + $0xb8] sm:$0xff] }
  0x72   : > { %719 = vmatpush.msrb.mxu2 %v501_v7  ;;  %741 = vmatpush.msrb.mxu3 %v569_v8  ;;  %v532_v44 = vld [vmem:[%s2462_s20 + $0x2d0] sm:$0xff]  ;;  %v533_v46 = vld [vmem:[%s2462_s20 + $0x2d8] sm:$0xff]  ;;  %v1148_v8 = vld [vmem:[%s2471_s22 + $0xe0] sm:$0xff] }
  0x73   : > { %674 = vmatpush.msrb.mxu0 %v496_v9  ;;  %696 = vmatpush.msrb.mxu1 %v564_v10  ;;  %v460_v47 = vld [vmem:[%s2462_s20 + $0x90] sm:$0xff]  ;;  %v461_v49 = vld [vmem:[%s2462_s20 + $0x98] sm:$0xff]  ;;  %v1144_v10 = vld [vmem:[%s2471_s22 + $0xc0] sm:$0xff] }
  0x74   : > { %720 = vmatpush.msrb.mxu2 %v497_v11  ;;  %742 = vmatpush.msrb.mxu3 %v565_v12  ;;  %v528_v48 = vld [vmem:[%s2462_s20 + $0x2b0] sm:$0xff]  ;;  %v529_v50 = vld [vmem:[%s2462_s20 + $0x2b8] sm:$0xff] }
  0x75   : > { %675 = vmatpush.msrb.mxu0 %v492_v13  ;;  %697 = vmatpush.msrb.mxu1 %v560_v14  ;;  %v456_v51 = vld [vmem:[%s2462_s20 + $0x70] sm:$0xff]  ;;  %v457_v53 = vld [vmem:[%s2462_s20 + $0x78] sm:$0xff]  ;;  %v1180_v13 = vld [vmem:[%s2471_s22 + $0x1e0] sm:$0xff] }
  0x76   : > { %721 = vmatpush.msrb.mxu2 %v493_v15  ;;  %743 = vmatpush.msrb.mxu3 %v561_v16  ;;  %v524_v52 = vld [vmem:[%s2462_s20 + $0x290] sm:$0xff]  ;;  %v525_v54 = vld [vmem:[%s2462_s20 + $0x298] sm:$0xff]  ;;  %v1140_v14 = vld [vmem:[%s2471_s22 + $0xa0] sm:$0xff] }
  0x77   : > { %599 = vmatmul.f32.gmra.mxu0 %v2568_v17  ;;  %645 = vmatmul.f32.gmra.mxu2 %v2568_v17  ;;  %v452_v55 = vld [vmem:[%s2462_s20 + $0x50] sm:$0xff]  ;;  %v453_v57 = vld [vmem:[%s2462_s20 + $0x58] sm:$0xff]  ;;  %v2645_v16 = vld [vmem:[%s373_s7] sm:$0xf] }
  0x78   : > { %676 = vmatpush.msrb.mxu0 %v488_v18  ;;  %698 = vmatpush.msrb.mxu1 %v556_v19  ;;  %v520_v56 = vld [vmem:[%s2462_s20 + $0x270] sm:$0xff]  ;;  %v521_v58 = vld [vmem:[%s2462_s20 + $0x278] sm:$0xff]  ;;  %v1176_v19 = vld [vmem:[%s2471_s22 + $0x1c0] sm:$0xff] }
  0x79   : > { %722 = vmatpush.msrb.mxu2 %v489_v20  ;;  %744 = vmatpush.msrb.mxu3 %v557_v21  ;;  %v448_v59 = vld [vmem:[%s2462_s20 + $0x30] sm:$0xff]  ;;  %v449_v61 = vld [vmem:[%s2462_s20 + $0x38] sm:$0xff]  ;;  %v572_v20 = vperm.slane %v2645_v16, 0  ;;  %v1136_v21 = vld [vmem:[%s2471_s22 + $0x80] sm:$0xff] }
  0x7a   : > { %622 = vmatmul.f32.gmra.mxu1 %v2576_v22  ;;  %668 = vmatmul.f32.gmra.mxu3 %v2576_v22  ;;  %v516_v60 = vld [vmem:[%s2462_s20 + $0x250] sm:$0xff]  ;;  %v517_v62 = vld [vmem:[%s2462_s20 + $0x258] sm:$0xff] }
  0x7b   : > { %677 = vmatpush.msrb.mxu0 %v484_v23  ;;  %699 = vmatpush.msrb.mxu1 %v552_v24  ;;  %v444_v0 = vld [vmem:[%s2462_s20 + $0x10] sm:$0xff]  ;;  %v445_v2 = vld [vmem:[%s2462_s20 + $0x18] sm:$0xff] }
  0x7c   : > { %723 = vmatpush.msrb.mxu2 %v485_v25  ;;  %745 = vmatpush.msrb.mxu3 %v553_v26  ;;  %v512_v1 = vld [vmem:[%s2462_s20 + $0x230] sm:$0xff]  ;;  %v513_v3 = vld [vmem:[%s2462_s20 + $0x238] sm:$0xff]  ;;  %v1172_v25 = vld [vmem:[%s2471_s22 + $0x1a0] sm:$0xff] }
  0x7d   : > { %678 = vmatpush.msrb.mxu0 %v480_v27  ;;  %700 = vmatpush.msrb.mxu1 %v548_v28  ;;  %v508_v5 = vld [vmem:[%s2462_s20 + $0x210] sm:$0xff]  ;;  %v509_v6 = vld [vmem:[%s2462_s20 + $0x218] sm:$0xff]  ;;  %v1132_v28 = vld [vmem:[%s2471_s22 + $0x60] sm:$0xff] }
  0x7e   : > { %724 = vmatpush.msrb.mxu2 %v481_v29  ;;  %746 = vmatpush.msrb.mxu3 %v549_v30  ;;  %v1150_v7 = vld [vmem:[%s2471_s22 + $0xf0] sm:$0xff] }
  0x7f   : > { %679 = vmatpush.msrb.mxu0 %v476_v31  ;;  %701 = vmatpush.msrb.mxu1 %v544_v32  ;;  %v1146_v9 = vld [vmem:[%s2471_s22 + $0xd0] sm:$0xff]  ;;  %v573_v31 = vperm.slane %v2645_v16, 1 }
  0x80   : > { %725 = vmatpush.msrb.mxu2 %v477_v33  ;;  %747 = vmatpush.msrb.mxu3 %v545_v34  ;;  %v1182_v11 = vld [vmem:[%s2471_s22 + $0x1f0] sm:$0xff]  ;;  %v1168_v33 = vld [vmem:[%s2471_s22 + $0x180] sm:$0xff] }
  0x81   : > { %680 = vmatpush.msrb.mxu0 %v472_v35  ;;  %702 = vmatpush.msrb.mxu1 %v540_v36  ;;  %v1142_v12 = vld [vmem:[%s2471_s22 + $0xb0] sm:$0xff]  ;;  %v1128_v35 = vld [vmem:[%s2471_s22 + $0x40] sm:$0xff] }
  0x82   : > { %726 = vmatpush.msrb.mxu2 %v473_v37  ;;  %748 = vmatpush.msrb.mxu3 %v541_v38  ;;  %v1178_v15 = vld [vmem:[%s2471_s22 + $0x1d0] sm:$0xff] }
  0x83   : > { %681 = vmatpush.msrb.mxu0 %v468_v39  ;;  %703 = vmatpush.msrb.mxu1 %v536_v40  ;;  %v1138_v18 = vld [vmem:[%s2471_s22 + $0x90] sm:$0xff] }
  0x84   : > { %727 = vmatpush.msrb.mxu2 %v469_v41  ;;  %749 = vmatpush.msrb.mxu3 %v537_v42  ;;  %v1174_v23 = vld [vmem:[%s2471_s22 + $0x1b0] sm:$0xff] }
  0x85   : > { %682 = vmatpush.msrb.mxu0 %v464_v43  ;;  %704 = vmatpush.msrb.mxu1 %v532_v44  ;;  %v1134_v24 = vld [vmem:[%s2471_s22 + $0x70] sm:$0xff]  ;;  %v1164_v43 = vld [vmem:[%s2471_s22 + $0x160] sm:$0xff] }
  0x86   : > { %728 = vmatpush.msrb.mxu2 %v465_v45  ;;  %750 = vmatpush.msrb.mxu3 %v533_v46  ;;  %v1170_v29 = vld [vmem:[%s2471_s22 + $0x190] sm:$0xff] }
  0x87   : > { %683 = vmatpush.msrb.mxu0 %v460_v47  ;;  %705 = vmatpush.msrb.mxu1 %v528_v48  ;;  %v1130_v32 = vld [vmem:[%s2471_s22 + $0x50] sm:$0xff]  ;;  %v1124_v48 = vld [vmem:[%s2471_s22 + $0x20] sm:$0xff] }
  0x88   : > { %729 = vmatpush.msrb.mxu2 %v461_v49  ;;  %751 = vmatpush.msrb.mxu3 %v529_v50  ;;  %v1166_v36 = vld [vmem:[%s2471_s22 + $0x170] sm:$0xff] }
  0x89   : > { %684 = vmatpush.msrb.mxu0 %v456_v51  ;;  %706 = vmatpush.msrb.mxu1 %v524_v52  ;;  %v1126_v42 = vld [vmem:[%s2471_s22 + $0x30] sm:$0xff] }
  0x8a   : > { %730 = vmatpush.msrb.mxu2 %v457_v53  ;;  %752 = vmatpush.msrb.mxu3 %v525_v54  ;;  %v1162_v49 = vld [vmem:[%s2471_s22 + $0x150] sm:$0xff] }
  0x8b   : > { %685 = vmatpush.msrb.mxu0 %v452_v55  ;;  %707 = vmatpush.msrb.mxu1 %v520_v56  ;;  %v1122_v54 = vld [vmem:[%s2471_s22 + $0x10] sm:$0xff]  ;;  %v1160_v55 = vld [vmem:[%s2471_s22 + $0x140] sm:$0xff] }
  0x8c   : > { %731 = vmatpush.msrb.mxu2 %v453_v57  ;;  %753 = vmatpush.msrb.mxu3 %v521_v58 }
  0x8d   : > { %686 = vmatpush.msrb.mxu0 %v448_v59  ;;  %708 = vmatpush.msrb.mxu1 %v516_v60  ;;  %v1120_v60 = vld [vmem:[%s2471_s22] sm:$0xff] }
  0x8e   : > { %732 = vmatpush.msrb.mxu2 %v449_v61  ;;  %754 = vmatpush.msrb.mxu3 %v517_v62  ;;  %v1158_v61 = vld [vmem:[%s2471_s22 + $0x130] sm:$0xff] }
  0x8f   : > { %687 = vmatpush.msrb.mxu0 %v444_v0  ;;  %709 = vmatpush.msrb.mxu1 %v512_v1 }
  0x90   : > { %733 = vmatpush.msrb.mxu2 %v445_v2  ;;  %755 = vmatpush.msrb.mxu3 %v513_v3  ;;  %v1214_v3 = vld [vmem:[%s2471_s22 + $0x2f0] sm:$0xff] }
  0x91   : > { %688 = vmatmul.f32.vlgmr.msrb.gmra.mxu0 %v2544_v63  ;;  %734 = vmatmul.f32.vlgmr.msrb.gmra.mxu2 %v2544_v63 }
  0x92   : > { %710 = vmatpush.msrb.mxu1 %v508_v5  ;;  %756 = vmatpush.msrb.mxu3 %v509_v6  ;;  %v1151_v5 = vld [vmem:[%s2471_s22 + $0xf8] sm:$0xff] }
  0x93   : > { %711 = vmatmul.f32.vlgmr.msrb.gmra.mxu1 %v2552_v4  ;;  %757 = vmatmul.f32.vlgmr.msrb.gmra.mxu3 %v2552_v4 }
  0x94   : > { %1248 = vmatpush.msra.mxu0 %v1150_v7  ;;  %1271 = vmatpush.msra.mxu1 %v1182_v11 }
  0x95   : > { %1294 = vmatpush.msra.mxu2 %v1214_v3  ;;  %v1244_v3 = vld [vmem:[%s2471_s22 + $0x3e0] sm:$0xff] }
  0x96   : > { %1249 = vmatpush.msra.mxu0 %v1148_v8  ;;  %1272 = vmatpush.msra.mxu1 %v1180_v13  ;;  %v1156_v8 = vld [vmem:[%s2471_s22 + $0x120] sm:$0xff]  ;;  %v1149_v13 = vld [vmem:[%s2471_s22 + $0xe8] sm:$0xff] }
  0x98   : > { %1250 = vmatpush.msra.mxu0 %v1146_v9  ;;  %1273 = vmatpush.msra.mxu1 %v1178_v15 }
  0x99   : > { %691 = vmatmul.f32.gmra.mxu0 %v2568_v17  ;;  %737 = vmatmul.f32.gmra.mxu2 %v2568_v17 }
  0x9a   : > { %1251 = vmatpush.msra.mxu0 %v1144_v10  ;;  %1274 = vmatpush.msra.mxu1 %v1176_v19  ;;  %v1154_v19 = vld [vmem:[%s2471_s22 + $0x110] sm:$0xff] }
  0x9b   : > { %714 = vmatmul.f32.gmra.mxu1 %v2576_v22  ;;  %760 = vmatmul.f32.gmra.mxu3 %v2576_v22 }
  0x9c   : > { %1252 = vmatpush.msra.mxu0 %v1142_v12  ;;  %1275 = vmatpush.msra.mxu1 %v1174_v23  ;;  %v1212_v12 = vld [vmem:[%s2471_s22 + $0x2e0] sm:$0xff] }
  0x9d   : > { %1295 = vmatpush.msra.mxu2 %v1212_v12 }
  0x9e   : > { %1253 = vmatpush.msra.mxu0 %v1140_v14  ;;  %1276 = vmatpush.msra.mxu1 %v1172_v25  ;;  %v1210_v25 = vld [vmem:[%s2471_s22 + $0x2d0] sm:$0xff] }
  0x9f   : > { %1296 = vmatpush.msra.mxu2 %v1210_v25 }
  0xa0   : > { %1254 = vmatpush.msra.mxu0 %v1138_v18  ;;  %1277 = vmatpush.msra.mxu1 %v1170_v29  ;;  %v1152_v29 = vld [vmem:[%s2471_s22 + $0x100] sm:$0xff] }
  0xa2   : > { %1255 = vmatpush.msra.mxu0 %v1136_v21  ;;  %1278 = vmatpush.msra.mxu1 %v1168_v33 }
  0xa4   : > { %1256 = vmatpush.msra.mxu0 %v1134_v24  ;;  %1279 = vmatpush.msra.mxu1 %v1166_v36 }
  0xa6   : > { %1257 = vmatpush.msra.mxu0 %v1132_v28  ;;  %1280 = vmatpush.msra.mxu1 %v1164_v43 }
  0xa8   : > { %1258 = vmatpush.msra.mxu0 %v1130_v32  ;;  %1281 = vmatpush.msra.mxu1 %v1162_v49 }
  0xaa   : > { %1259 = vmatpush.msra.mxu0 %v1128_v35  ;;  %1282 = vmatpush.msra.mxu1 %v1160_v55 }
  0xac   : > { %1260 = vmatpush.msra.mxu0 %v1126_v42  ;;  %1283 = vmatpush.msra.mxu1 %v1158_v61 }
  0xae   : > { %1261 = vmatpush.msra.mxu0 %v1124_v48  ;;  %1284 = vmatpush.msra.mxu1 %v1156_v8 }
  0xb0   : > { %1262 = vmatpush.msra.mxu0 %v1122_v54  ;;  %1285 = vmatpush.msra.mxu1 %v1154_v19  ;;  %v574_v19 = vperm.slane %v2645_v16, 2 }
  0xb2   : > { %1263 = vmatpush.msra.mxu0 %v1120_v60  ;;  %1286 = vmatpush.msra.mxu1 %v1152_v29  ;;  %v1177_v29 = vld [vmem:[%s2471_s22 + $0x1c8] sm:$0xff] }
  0xb4   : > { %1340 = vmatpush.msrb.mxu0 %v1151_v5  ;;  %v1143_v5 = vld [vmem:[%s2471_s22 + $0xb8] sm:$0xff] }
  0xb6   : > { %1341 = vmatpush.msrb.mxu0 %v1149_v13 }
  0xea   : > { %v597_v26 = vpop.f32.mrf.mxu0 }
  0xeb   : > { %v598_v27 = vadd.f32 %v597_v26, %v572_v20  ;;  %v1147_v26 = vld [vmem:[%s2471_s22 + $0xd8] sm:$0xff] }
  0xec   : > { %1342 = vmatpush.msrb.mxu0 %v1147_v26 }
  0xed   : > { %v620_v30 = vpop.f32.mrf.mxu1 }
  0xee   : > { %v2659_v34 = vadd.f32 %v620_v30, %v598_v27 }
  0xf0   : > { %v2664_v37 = vmul.f32 0.70710677, %v2659_v34  ;;  %v643_v38 = vpop.f32.mrf.mxu2 }
  0xf1   : > { %v644_v39 = vadd.f32 %v643_v38, %v573_v31 }
  0xf2   : > { %v780_v40 = vmul.f32 %v2664_v37, %v2664_v37 }
  0xf3   : > { %v666_v41 = vpop.f32.mrf.mxu3 }
  0xf4   : > { %v2670_v44 = vmin.f32 %v780_v40, 16.0  ;;  %v600_v45 = vpop.f32.mrf.mxu0  ;;  %v2672_v46 = vadd.f32 %v666_v41, %v644_v39 }
  0xf5   : > { %v601_v47 = vadd.f32 %v600_v45, %v572_v20 }
  0xf6   : > { %v782_v50 = vmul.f32 2.1237322e-06, %v2670_v44  ;;  %v793_v51 = vmul.f32 3.8918573e-05, %v2670_v44  ;;  %v2679_v52 = vmul.f32 0.70710677, %v2672_v46 }
  0xf7   : > { %v623_v53 = vpop.f32.mrf.mxu1 }
  0xf8   : > { %v783_v56 = vadd.f32 0.00028619796, %v782_v50  ;;  %v794_v57 = vadd.f32 0.001143296, %v793_v51  ;;  %v2683_v58 = vadd.f32 %v623_v53, %v601_v47  ;;  %v820_v59 = vmul.f32 %v2679_v52, %v2679_v52  ;;  %v1208_v50 = vld [vmem:[%s2471_s22 + $0x2c0] sm:$0xff]  ;;  %v1246_v51 = vld [vmem:[%s2471_s22 + $0x3f0] sm:$0xff] }
  0xf9   : > { %v1145_v53 = vld [vmem:[%s2471_s22 + $0xc8] sm:$0xff]  ;;  %1297 = vmatpush.msra.mxu2 %v1208_v50  ;;  %1317 = vmatpush.msra.mxu3 %v1246_v51 }
  0xfa   : > { %v784_v62 = vmul.f32 %v783_v56, %v2670_v44  ;;  %v795_v0 = vmul.f32 %v794_v57, %v2670_v44  ;;  %v2692_v1 = vmul.f32 0.70710677, %v2683_v58  ;;  %v646_v2 = vpop.f32.mrf.mxu2  ;;  %v2696_v6 = vmin.f32 %v820_v59, 16.0  ;;  %v1183_v57 = vld [vmem:[%s2471_s22 + $0x1f8] sm:$0xff]  ;;  %1343 = vmatpush.msrb.mxu0 %v1145_v53 }
  0xfb   : > { %v647_v7 = vadd.f32 %v646_v2, %v573_v31  ;;  %1363 = vmatpush.msrb.mxu1 %v1183_v57  ;;  %v1206_v2 = vld [vmem:[%s2471_s22 + $0x2b0] sm:$0xff]  ;;  %1318 = vmatpush.msra.mxu3 %v1244_v3  ;;  %v575_v3 = vperm.slane %v2645_v16, 3 }
  0xfc   : > { %v785_v9 = vadd.f32 0.0036580483, %v784_v62  ;;  %v796_v10 = vadd.f32 0.014752088, %v795_v0  ;;  %v940_v11 = vmul.f32 %v2692_v1, %v2692_v1  ;;  %v822_v14 = vmul.f32 2.1237322e-06, %v2696_v6  ;;  %1298 = vmatpush.msra.mxu2 %v1206_v2  ;;  %1344 = vmatpush.msrb.mxu0 %v1143_v5 }
  0xfd   : > { %v833_v15 = vmul.f32 3.8918573e-05, %v2696_v6  ;;  %v669_v18 = vpop.f32.mrf.mxu3  ;;  %v1171_v5 = vld [vmem:[%s2471_s22 + $0x198] sm:$0xff] }
  0xfe   : > { %v786_v20 = vmul.f32 %v785_v9, %v2670_v44  ;;  %v797_v21 = vmul.f32 %v796_v10, %v2670_v44  ;;  %v2708_v23 = vmin.f32 %v940_v11, 16.0  ;;  %v2710_v24 = vadd.f32 %v669_v18, %v647_v7  ;;  %v1181_v9 = vld [vmem:[%s2471_s22 + $0x1e8] sm:$0xff]  ;;  %v1204_v10 = vld [vmem:[%s2471_s22 + $0x2a0] sm:$0xff]  ;;  %v1242_v11 = vld [vmem:[%s2471_s22 + $0x3d0] sm:$0xff] }
  0xff   : > { %v823_v27 = vadd.f32 0.00028619796, %v822_v14  ;;  %v834_v28 = vadd.f32 0.001143296, %v833_v15  ;;  %1364 = vmatpush.msrb.mxu1 %v1181_v9  ;;  %v1141_v14 = vld [vmem:[%s2471_s22 + $0xa8] sm:$0xff]  ;;  %v1179_v15 = vld [vmem:[%s2471_s22 + $0x1d8] sm:$0xff]  ;;  %1299 = vmatpush.msra.mxu2 %v1204_v10 }
 0x100   : > { %v787_v30 = vadd.f32 0.05243302, %v786_v20  ;;  %v798_v31 = vadd.f32 0.112945676, %v797_v21  ;;  %v942_v32 = vmul.f32 2.1237322e-06, %v2708_v23  ;;  %1319 = vmatpush.msra.mxu3 %v1242_v11  ;;  %1345 = vmatpush.msrb.mxu0 %v1141_v14 }
 0x101   : > { %v824_v33 = vmul.f32 %v823_v27, %v2696_v6  ;;  %v835_v35 = vmul.f32 %v834_v28, %v2696_v6  ;;  %v2719_v36 = vmul.f32 0.70710677, %v2710_v24  ;;  %v953_v43 = vmul.f32 3.8918573e-05, %v2708_v23  ;;  %v1202_v20 = vld [vmem:[%s2471_s22 + $0x290] sm:$0xff]  ;;  %1365 = vmatpush.msrb.mxu1 %v1179_v15  ;;  %v1240_v27 = vld [vmem:[%s2471_s22 + $0x3c0] sm:$0xff] }
 0x102   : > { %v799_v38 = vmul.f32 %v798_v31, %v2670_v44  ;;  %v943_v39 = vadd.f32 0.00028619796, %v942_v32  ;;  %v788_v45 = vmul.f32 %v787_v30, %v2670_v44  ;;  %v1139_v28 = vld [vmem:[%s2471_s22 + $0x98] sm:$0xff]  ;;  %1300 = vmatpush.msra.mxu2 %v1202_v20  ;;  %1320 = vmatpush.msra.mxu3 %v1240_v27  ;;  %v1200_v31 = vld [vmem:[%s2471_s22 + $0x280] sm:$0xff]  ;;  %v1238_v32 = vld [vmem:[%s2471_s22 + $0x3b0] sm:$0xff] }
 0x103   : > { %v825_v40 = vadd.f32 0.0036580483, %v824_v33  ;;  %v836_v41 = vadd.f32 0.014752088, %v835_v35  ;;  %v980_v42 = vmul.f32 %v2719_v36, %v2719_v36  ;;  %v954_v61 = vadd.f32 0.001143296, %v953_v43  ;;  %1346 = vmatpush.msrb.mxu0 %v1139_v28  ;;  %1366 = vmatpush.msrb.mxu1 %v1177_v29 }
 0x104   : > { %v800_v47 = vadd.f32 0.4994258, %v799_v38  ;;  %v944_v55 = vmul.f32 %v943_v39, %v2708_v23  ;;  %v789_v62 = vadd.f32 0.18741608, %v788_v45  ;;  %v1137_v33 = vld [vmem:[%s2471_s22 + $0x88] sm:$0xff]  ;;  %v1175_v39 = vld [vmem:[%s2471_s22 + $0x1b8] sm:$0xff]  ;;  %1301 = vmatpush.msra.mxu2 %v1200_v31  ;;  %1321 = vmatpush.msra.mxu3 %v1238_v32 }
 0x105   : > { %v826_v48 = vmul.f32 %v825_v40, %v2696_v6  ;;  %v837_v49 = vmul.f32 %v836_v41, %v2696_v6  ;;  %v2733_v56 = vmin.f32 %v980_v42, 16.0  ;;  %v955_v21 = vmul.f32 %v954_v61, %v2708_v23  ;;  %v1198_v42 = vld [vmem:[%s2471_s22 + $0x270] sm:$0xff]  ;;  %v1236_v43 = vld [vmem:[%s2471_s22 + $0x3a0] sm:$0xff]  ;;  %v1135_v45 = vld [vmem:[%s2471_s22 + $0x78] sm:$0xff]  ;;  %1347 = vmatpush.msrb.mxu0 %v1137_v33  ;;  %1367 = vmatpush.msrb.mxu1 %v1175_v39 }
 0x106   : > { %v801_v54 = vmul.f32 %v800_v47, %v2670_v44  ;;  %v945_v12 = vadd.f32 0.0036580483, %v944_v55  ;;  %v790_v25 = vmul.f32 %v789_v62, %v2670_v44  ;;  %1302 = vmatpush.msra.mxu2 %v1198_v42  ;;  %1322 = vmatpush.msra.mxu3 %v1236_v43  ;;  %v2783_v61 = vmul.f32 0.5, %v2659_v34  ;;  %v1194_v10 = vld [vmem:[%s2471_s22 + $0x250] sm:$0xff]  ;;  %v1232_v34 = vld [vmem:[%s2471_s22 + $0x380] sm:$0xff]  ;;  %v1131_v11 = vld [vmem:[%s2471_s22 + $0x58] sm:$0xff] }
 0x107   : > { %v827_v59 = vadd.f32 0.05243302, %v826_v48  ;;  %v838_v60 = vadd.f32 0.112945676, %v837_v49  ;;  %v982_v13 = vmul.f32 2.1237322e-06, %v2733_v56  ;;  %1348 = vmatpush.msrb.mxu0 %v1135_v45 }
 0x108   : > { %v2736_v0 = vadd.f32 1.0, %v801_v54  ;;  %v946_v35 = vmul.f32 %v945_v12, %v2708_v23  ;;  %v956_v47 = vadd.f32 0.014752088, %v955_v21  ;;  %v791_v49 = vadd.f32 1.1283791, %v790_v25  ;;  %v1173_v54 = vld [vmem:[%s2471_s22 + $0x1a8] sm:$0xff] }
 0x109   : > { %v828_v7 = vmul.f32 %v827_v59, %v2696_v6  ;;  %v839_v8 = vmul.f32 %v838_v60, %v2696_v6  ;;  %v983_v44 = vadd.f32 0.00028619796, %v982_v13  ;;  %v1196_v59 = vld [vmem:[%s2471_s22 + $0x260] sm:$0xff]  ;;  %v1234_v60 = vld [vmem:[%s2471_s22 + $0x390] sm:$0xff]  ;;  %1368 = vmatpush.msrb.mxu1 %v1173_v54  ;;  %v1129_v27 = vld [vmem:[%s2471_s22 + $0x48] sm:$0xff] }
 0x10a   : > { %2000 = vrcp.f32 %v2736_v0  ;;  %v812_v50 = vand.u32 2147483647, %v2736_v0  ;;  %v814_v57 = vand.u32 2147483648, %v2736_v0  ;;  %v947_v62 = vadd.f32 0.05243302, %v946_v35  ;;  %1303 = vmatpush.msra.mxu2 %v1196_v59  ;;  %1323 = vmatpush.msra.mxu3 %v1234_v60  ;;  %v1192_v25 = vld [vmem:[%s2471_s22 + $0x240] sm:$0xff] }
 0x10b   : > { %v840_v18 = vadd.f32 0.4994258, %v839_v8  ;;  %v829_v26 = vadd.f32 0.18741608, %v828_v7  ;;  %v984_v2 = vmul.f32 %v983_v44, %v2733_v56  ;;  %v2789_v8 = vmul.f32 0.5, %v2672_v46  ;;  %1369 = vmatpush.msrb.mxu1 %v1171_v5  ;;  %v1167_v33 = vld [vmem:[%s2471_s22 + $0x178] sm:$0xff] }
 0x10c   : > { %v957_v12 = vmul.f32 %v956_v47, %v2708_v23  ;;  %v792_v13 = vmul.f32 %v791_v49, %v2664_v37  ;;  %vm808_vm0 = vweird.f32 %v2736_v0  ;;  %vm2799_vm1 = vcmp.eq.f32.partialorder %v812_v50, 8.507059e+37  ;;  %1304 = vmatpush.msra.mxu2 %v1194_v10  ;;  %1324 = vmatpush.msra.mxu3 %v1232_v34 }
 0x10d   : > { %v841_v30 = vmul.f32 %v840_v18, %v2696_v6  ;;  %v830_v51 = vmul.f32 %v829_v26, %v2696_v6  ;;  %v1133_v6 = vld [vmem:[%s2471_s22 + $0x68] sm:$0xff]  ;;  %v815_v21 = vor.u32 1.1754944e-38, %v814_v57  ;;  %v1230_v26 = vld [vmem:[%s2471_s22 + $0x370] sm:$0xff]  ;;  %v2813_v28 = vmul.f32 %v947_v62, %v2708_v23 }
 0x10e   : > { %v689_v38 = vpop.f32.mrf.mxu0  ;;  %1349 = vmatpush.msrb.mxu0 %v1133_v6  ;;  %v1169_v18 = vld [vmem:[%s2471_s22 + $0x188] sm:$0xff]  ;;  %v2815_v29 = vadd.f32 0.0036580483, %v984_v2  ;;  %v2821_v35 = vmul.f32 3.8918573e-05, %v2733_v56  ;;  %1305 = vmatpush.msra.mxu2 %v1192_v25 }
 0x10f   : > { %v2763_v40 = vadd.f32 1.0, %v841_v30  ;;  %v690_v41 = vadd.f32 %v689_v38, %v574_v19  ;;  %v831_v46 = vadd.f32 1.1283791, %v830_v51  ;;  %1370 = vmatpush.msrb.mxu1 %v1169_v18  ;;  %1325 = vmatpush.msra.mxu3 %v1230_v26  ;;  %v958_v42 = vadd.f32 0.112945676, %v957_v12 }
 0x110   : > { %v2770_v48 = vpop.eup %2000  ;;  %v712_v53 = vpop.f32.mrf.mxu1  ;;  %1350 = vmatpush.msrb.mxu0 %v1131_v11 }
 0x111   : > { %v804_v55 = vmul.f32 %v2770_v48, %v2736_v0  ;;  %2002 = vrcp.f32 %v2763_v40  ;;  %v2791_v9 = vadd.f32 %v712_v53, %v690_v41  ;;  %vm809_vm2 = vweird.f32 %v2770_v48  ;;  %1371 = vmatpush.msrb.mxu1 %v1167_v33 }
 0x112   : > { %vm810_vm3 = vmor %vm808_vm0, %vm809_vm2  ;;  %v832_v43 = vmul.f32 %v831_v46, %v2679_v52  ;;  %vm848_vm4 = vweird.f32 %v2763_v40  ;;  %1351 = vmatpush.msrb.mxu0 %v1129_v27  ;;  %v852_v50 = vand.u32 2147483647, %v2763_v40  ;;  %v854_v54 = vand.u32 2147483648, %v2763_v40 }
 0x113   : > { %v805_v7 = vsub.f32 1.0, %v804_v55  ;;  %v2807_v37 = vmul.f32 0.70710677, %v2791_v9  ;;  %v959_v60 = vmul.f32 %v958_v42, %v2708_v23 }
 0x114   : > { %v735_v15 = vpop.f32.mrf.mxu2  ;;  %vm2857_vm6 = vcmp.eq.f32.partialorder %v852_v50, 8.507059e+37  ;;  %v1127_v50 = vld [vmem:[%s2471_s22 + $0x38] sm:$0xff] }
 0x115   : > { %v806_v20 = vmul.f32 %v2770_v48, %v805_v7  ;;  %v736_v30 = vadd.f32 %v735_v15, %v575_v3  ;;  %v860_v39 = vmul.f32 %v2807_v37, %v2807_v37  ;;  %1352 = vmatpush.msrb.mxu0 %v1127_v50 }
 0x116   : > { %v692_v31 = vpop.f32.mrf.mxu0  ;;  %v758_v32 = vpop.f32.mrf.mxu3 }
 0x117   : > { %v2003_v44 = vpop.eup %2002  ;;  %v807_v38 = vadd.f32 %v2770_v48, %v806_v20  ;;  %v693_v41 = vadd.f32 %v692_v31, %v574_v19  ;;  %v2835_v47 = vadd.f32 %v758_v32, %v736_v30  ;;  %v2839_v51 = vmin.f32 %v860_v39, 16.0 }
 0x118   : > { %v844_v45 = vmul.f32 %v2003_v44, %v2763_v40  ;;  %v715_v49 = vpop.f32.mrf.mxu1  ;;  %vm849_vm5 = vweird.f32 %v2003_v44 }
 0x119   : > { %v811_v19 = vsel %vm810_vm3, %v2770_v48, %v807_v38  ;;  %v2841_v53 = vadd.f32 %v715_v49, %v693_v41  ;;  %v2847_v55 = vmul.f32 0.70710677, %v2835_v47  ;;  %v862_v59 = vmul.f32 2.1237322e-06, %v2839_v51  ;;  %vm850_vm7 = vmor %vm848_vm4, %vm849_vm5  ;;  %v1190_v49 = vld [vmem:[%s2471_s22 + $0x230] sm:$0xff] }
 0x11a   : > { %v816_v52 = vsel %vm2799_vm1, %v815_v21, %v811_v19  ;;  %v845_v0 = vsub.f32 1.0, %v844_v45  ;;  %v873_v48 = vmul.f32 3.8918573e-05, %v2839_v51  ;;  %v960_v21 = vadd.f32 0.4994258, %v959_v60  ;;  %v1228_v19 = vld [vmem:[%s2471_s22 + $0x360] sm:$0xff]  ;;  %1306 = vmatpush.msra.mxu2 %v1190_v49 }
 0x11b   : > { %v817_v57 = vmul.f32 %v816_v52, %v792_v13  ;;  %v900_v62 = vmul.f32 %v2847_v55, %v2847_v55  ;;  %v2855_v2 = vmul.f32 0.70710677, %v2841_v53  ;;  %v863_v34 = vadd.f32 0.00028619796, %v862_v59  ;;  %1326 = vmatpush.msra.mxu3 %v1228_v19 }
 0x11c   : > { %v846_v6 = vmul.f32 %v2003_v44, %v845_v0  ;;  %v738_v5 = vpop.f32.mrf.mxu2  ;;  %v874_v11 = vadd.f32 0.001143296, %v873_v48  ;;  %v855_v13 = vor.u32 1.1754944e-38, %v854_v54  ;;  %v1165_v0 = vld [vmem:[%s2471_s22 + $0x168] sm:$0xff]  ;;  %v994_v54 = vadd.f32 0.001143296, %v2821_v35 }
 0x11d   : > { %v1879_v7 = vclamps-f32 %v817_v57, 1.0  ;;  %v2861_v14 = vmin.f32 %v900_v62, 16.0  ;;  %v739_v46 = vadd.f32 %v738_v5, %v575_v3  ;;  %v864_v18 = vmul.f32 %v863_v34, %v2839_v51  ;;  %1372 = vmatpush.msrb.mxu1 %v1165_v0 }
 0x11e   : > { %v847_v12 = vadd.f32 %v2003_v44, %v846_v6  ;;  %v875_v20 = vmul.f32 %v874_v11, %v2839_v51  ;;  %v1020_v30 = vmul.f32 %v2855_v2, %v2855_v2  ;;  %v761_v16 = vpop.f32.mrf.mxu3  ;;  %v986_v35 = vmul.f32 %v2815_v29, %v2733_v56  ;;  %v1226_v11 = vld [vmem:[%s2471_s22 + $0x350] sm:$0xff] }
 0x11f   : > { %v1100_v15 = vadd.f32 1.0, %v1879_v7  ;;  %v902_v26 = vmul.f32 2.1237322e-06, %v2861_v14  ;;  %v913_v27 = vmul.f32 3.8918573e-05, %v2861_v14  ;;  %v2881_v45 = vadd.f32 %v761_v16, %v739_v46  ;;  %v1188_v7 = vld [vmem:[%s2471_s22 + $0x220] sm:$0xff]  ;;  %1327 = vmatpush.msra.mxu3 %v1226_v11 }
 0x120   : > { %v851_v25 = vsel %vm850_vm7, %v2003_v44, %v847_v12  ;;  %v865_v31 = vadd.f32 0.0036580483, %v864_v18  ;;  %v876_v32 = vadd.f32 0.014752088, %v875_v20  ;;  %v949_v44 = vadd.f32 0.18741608, %v2813_v28  ;;  %1307 = vmatpush.msra.mxu2 %v1188_v7 }
 0x121   : > { %v2874_v40 = vmul.f32 %v1100_v15, %v2783_v61  ;;  %v856_v3 = vsel %vm2857_vm6, %v855_v13, %v851_v25  ;;  %v903_v38 = vadd.f32 0.00028619796, %v902_v26  ;;  %v914_v39 = vadd.f32 0.001143296, %v913_v27  ;;  %v1125_v12 = vld [vmem:[%s2471_s22 + $0x28] sm:$0xff]  ;;  %v1163_v13 = vld [vmem:[%s2471_s22 + $0x158] sm:$0xff] }
 0x122   : > { %v857_v33 = vmul.f32 %v856_v3, %v832_v43  ;;  %v866_v41 = vmul.f32 %v865_v31, %v2839_v51  ;;  %v877_v42 = vmul.f32 %v876_v32, %v2839_v51  ;;  %v961_v61 = vmul.f32 %v960_v21, %v2708_v23  ;;  %1353 = vmatpush.msrb.mxu0 %v1125_v12  ;;  %v1186_v29 = vld [vmem:[%s2471_s22 + $0x210] sm:$0xff]  ;;  %v1224_v20 = vld [vmem:[%s2471_s22 + $0x340] sm:$0xff]  ;;  %v1123_v21 = vld [vmem:[%s2471_s22 + $0x18] sm:$0xff] }
 0x123   : > { %1264 = vmatmul.f32.vlgmr.msra.gmra.mxu0 %v2874_v40  ;;  %v904_v28 = vmul.f32 %v903_v38, %v2861_v14  ;;  %v915_v43 = vmul.f32 %v914_v39, %v2861_v14  ;;  %v2892_v48 = vmin.f32 %v1020_v30, 16.0  ;;  %v2901_v34 = vmul.f32 0.70710677, %v2881_v45  ;;  %1373 = vmatpush.msrb.mxu1 %v1163_v13  ;;  %v1161_v30 = vld [vmem:[%s2471_s22 + $0x148] sm:$0xff] }
 0x124   : > { %v1880_v52 = vclamps-f32 %v857_v33, 1.0  ;;  %v867_v57 = vadd.f32 0.05243302, %v866_v41  ;;  %v878_v59 = vadd.f32 0.112945676, %v877_v42  ;;  %v2894_v60 = vadd.f32 1.0, %v961_v61  ;;  %1308 = vmatpush.msra.mxu2 %v1186_v29  ;;  %1328 = vmatpush.msra.mxu3 %v1224_v20 }
 0x125   : > { %v905_v62 = vadd.f32 0.0036580483, %v904_v28  ;;  %v916_v5 = vadd.f32 0.014752088, %v915_v43  ;;  %v950_v25 = vmul.f32 %v949_v44, %v2708_v23  ;;  %v1022_v3 = vmul.f32 2.1237322e-06, %v2892_v48  ;;  %1354 = vmatpush.msrb.mxu0 %v1123_v21  ;;  %1374 = vmatpush.msrb.mxu1 %v1161_v30 }
 0x126   : > { %v1101_v6 = vadd.f32 1.0, %v1880_v52  ;;  %v879_v10 = vmul.f32 %v878_v59, %v2839_v51  ;;  %2004 = vrcp.f32 %v2894_v60  ;;  %v868_v26 = vmul.f32 %v867_v57, %v2839_v51 }
 0x127   : > { %v906_v15 = vmul.f32 %v905_v62, %v2861_v14  ;;  %v917_v18 = vmul.f32 %v916_v5, %v2861_v14  ;;  %v1060_v32 = vmul.f32 %v2901_v34, %v2901_v34  ;;  %v995_v23 = vmul.f32 %v994_v54, %v2733_v56 }
 0x128   : > { %v2908_v46 = vmul.f32 %v1101_v6, %v2789_v8  ;;  %v880_v27 = vadd.f32 0.4994258, %v879_v10  ;;  %v987_v33 = vadd.f32 0.05243302, %v986_v35  ;;  %v951_v39 = vadd.f32 1.1283791, %v950_v25 }
 0x129   : > { %v907_v16 = vadd.f32 0.05243302, %v906_v15  ;;  %v918_v8 = vadd.f32 0.112945676, %v917_v18  ;;  %v869_v41 = vadd.f32 0.18741608, %v868_v26  ;;  %vm968_vm9 = vweird.f32 %v2894_v60 }
 0x12a   : > { %1287 = vmatmul.f32.vlgmr.msra.gmra.mxu1 %v2908_v46  ;;  %v881_v31 = vmul.f32 %v880_v27, %v2839_v51  ;;  %v1023_v19 = vadd.f32 0.00028619796, %v1022_v3  ;;  %v2930_v52 = vmin.f32 %v1060_v32, 16.0  ;;  %v996_v28 = vadd.f32 0.014752088, %v995_v23 }
 0x12b   : > { %v919_v44 = vmul.f32 %v918_v8, %v2861_v14  ;;  %v908_v61 = vmul.f32 %v907_v16, %v2861_v14  ;;  %v2933_v43 = vmul.f32 0.5, %v2683_v58  ;;  %v988_v0 = vmul.f32 %v987_v33, %v2733_v56 }
 0x12c   : > { %v2005_v38 = vpop.eup %2004  ;;  %v2925_v42 = vadd.f32 1.0, %v881_v31  ;;  %v952_v57 = vmul.f32 %v951_v39, %v2692_v1  ;;  %v870_v59 = vmul.f32 %v869_v41, %v2839_v51  ;;  %v1024_v7 = vmul.f32 %v1023_v19, %v2892_v48  ;;  %v1184_v39 = vld [vmem:[%s2471_s22 + $0x200] sm:$0xff]  ;;  %v1121_v41 = vld [vmem:[%s2471_s22 + $0x8] sm:$0xff]  ;;  %v1159_v19 = vld [vmem:[%s2471_s22 + $0x138] sm:$0xff] }
 0x12d   : > { %v920_v49 = vadd.f32 0.4994258, %v919_v44  ;;  %v964_v50 = vmul.f32 %v2005_v38, %v2894_v60  ;;  %v909_v6 = vadd.f32 0.18741608, %v908_v61  ;;  %v972_v35 = vand.u32 2147483647, %v2894_v60  ;;  %1309 = vmatpush.msra.mxu2 %v1184_v39  ;;  %1355 = vmatpush.msrb.mxu0 %v1121_v41 }
 0x12e   : > { %2006 = vrcp.f32 %v2925_v42  ;;  %v974_v10 = vand.u32 2147483648, %v2894_v60  ;;  %v1062_v58 = vmul.f32 2.1237322e-06, %v2930_v52  ;;  %vm969_vm8 = vweird.f32 %v2005_v38  ;;  %1375 = vmatpush.msrb.mxu1 %v1159_v19 }
 0x12f   : > { %v921_v54 = vmul.f32 %v920_v49, %v2861_v14  ;;  %v965_v62 = vsub.f32 1.0, %v964_v50  ;;  %v997_v12 = vmul.f32 %v996_v28, %v2733_v56  ;;  %v2946_v13 = vadd.f32 0.18741608, %v988_v0  ;;  %vm970_vm10 = vmor %vm968_vm9, %vm969_vm8  ;;  %v1215_v50 = vld [vmem:[%s2471_s22 + $0x2f8] sm:$0xff]  ;;  %v1220_v28 = vld [vmem:[%s2471_s22 + $0x320] sm:$0xff] }
 0x130   : > { %v1033_v1 = vmul.f32 3.8918573e-05, %v2892_v48  ;;  %v871_v15 = vadd.f32 1.1283791, %v870_v59  ;;  %v892_v18 = vand.u32 2147483647, %v2925_v42  ;;  %v910_v29 = vmul.f32 %v909_v6, %v2861_v14  ;;  %1386 = vmatpush.msrb.mxu2 %v1215_v50 }
 0x131   : > { %v2939_v5 = vadd.f32 1.0, %v921_v54  ;;  %v966_v11 = vmul.f32 %v2005_v38, %v965_v62  ;;  %v2957_v25 = vadd.f32 0.0036580483, %v1024_v7  ;;  %v975_v26 = vor.u32 1.1754944e-38, %v974_v10  ;;  %v1157_v6 = vld [vmem:[%s2471_s22 + $0x128] sm:$0xff]  ;;  %v1218_v7 = vld [vmem:[%s2471_s22 + $0x310] sm:$0xff] }
 0x132   : > { %v998_v60 = vadd.f32 0.112945676, %v997_v12  ;;  %v894_v27 = vand.u32 2147483648, %v2925_v42  ;;  %v1063_v30 = vadd.f32 0.00028619796, %v1062_v58  ;;  %vm973_vm11 = vcmp.eq.f32.partialorder %v972_v35, 8.507059e+37  ;;  %1376 = vmatpush.msrb.mxu1 %v1157_v6 }
 0x133   : > { %2008 = vrcp.f32 %v2939_v5  ;;  %v967_v20 = vadd.f32 %v2005_v38, %v966_v11  ;;  %v1034_v31 = vadd.f32 0.001143296, %v1033_v1  ;;  %v872_v32 = vmul.f32 %v871_v15, %v2807_v37  ;;  %v1213_v62 = vld [vmem:[%s2471_s22 + $0x2e8] sm:$0xff]  ;;  %v1155_v58 = vld [vmem:[%s2471_s22 + $0x118] sm:$0xff] }
 0x134   : > { %v2951_v51 = vpop.eup %2006  ;;  %v999_v14 = vmul.f32 %v998_v60, %v2733_v56  ;;  %vm2962_vm12 = vcmp.eq.f32.partialorder %v892_v18, 8.507059e+37  ;;  %v2966_v33 = vadd.f32 1.1283791, %v910_v29  ;;  %vm888_vm14 = vweird.f32 %v2925_v42  ;;  %1387 = vmatpush.msrb.mxu2 %v1213_v62  ;;  %1377 = vmatpush.msrb.mxu1 %v1155_v58  ;;  %v1203_v62 = vld [vmem:[%s2471_s22 + $0x298] sm:$0xff] }
 0x135   : > { %v884_v21 = vmul.f32 %v2951_v51, %v2925_v42  ;;  %v971_v16 = vsel %vm970_vm10, %v2005_v38, %v967_v20  ;;  %v1222_v38 = vld [vmem:[%s2471_s22 + $0x330] sm:$0xff]  ;;  %vm889_vm13 = vweird.f32 %v2951_v51  ;;  %v1035_v0 = vmul.f32 %v1034_v31, %v2892_v48  ;;  %v1153_v42 = vld [vmem:[%s2471_s22 + $0x108] sm:$0xff] }
 0x136   : > { %v976_v3 = vsel %vm973_vm11, %v975_v26, %v971_v16  ;;  %v1000_v37 = vadd.f32 0.4994258, %v999_v14  ;;  %1329 = vmatpush.msra.mxu3 %v1222_v38  ;;  %v1073_v12 = vmul.f32 3.8918573e-05, %v2930_v52  ;;  %vm2994_vm15 = vmor %vm888_vm14, %vm889_vm13  ;;  %v895_v15 = vor.u32 1.1754944e-38, %v894_v27  ;;  %v1216_v26 = vld [vmem:[%s2471_s22 + $0x300] sm:$0xff]  ;;  %1378 = vmatpush.msrb.mxu1 %v1153_v42 }
 0x137   : > { %v885_v8 = vsub.f32 1.0, %v884_v21  ;;  %v977_v44 = vmul.f32 %v976_v3, %v952_v57  ;;  %v932_v57 = vand.u32 2147483647, %v2939_v5  ;;  %v1036_v11 = vadd.f32 0.014752088, %v1035_v0  ;;  %v1211_v21 = vld [vmem:[%s2471_s22 + $0x2d8] sm:$0xff] }
 0x138   : > { %v1001_v10 = vmul.f32 %v1000_v37, %v2733_v56  ;;  %1330 = vmatpush.msra.mxu3 %v1220_v28  ;;  %v934_v29 = vand.u32 2147483648, %v2939_v5  ;;  %1388 = vmatpush.msrb.mxu2 %v1211_v21  ;;  %v766_v23 = vmul.f32 0.5, %v2791_v9  ;;  %vm928_vm1 = vweird.f32 %v2939_v5  ;;  %v1207_v38 = vld [vmem:[%s2471_s22 + $0x2b8] sm:$0xff]  ;;  %v1245_v37 = vld [vmem:[%s2471_s22 + $0x3e8] sm:$0xff] }
 0x139   : > { %v2971_v61 = vpop.eup %2008  ;;  %v886_v49 = vmul.f32 %v2951_v51, %v885_v8  ;;  %v1883_v59 = vclamps-f32 %v977_v44, 1.0  ;;  %v1074_v8 = vadd.f32 0.001143296, %v1073_v12  ;;  %v1064_v44 = vmul.f32 %v1063_v30, %v2930_v52  ;;  %v1201_v21 = vld [vmem:[%s2471_s22 + $0x288] sm:$0xff] }
 0x13a   : > { %v924_v54 = vmul.f32 %v2971_v61, %v2939_v5  ;;  %vm929_vm0 = vweird.f32 %v2971_v61  ;;  %v3005_v16 = vadd.f32 1.0, %v1001_v10  ;;  %1331 = vmatpush.msra.mxu3 %v1218_v7  ;;  %v990_v41 = vmul.f32 %v2946_v13, %v2733_v56  ;;  %v1205_v56 = vld [vmem:[%s2471_s22 + $0x2a8] sm:$0xff]  ;;  %v1243_v13 = vld [vmem:[%s2471_s22 + $0x3d8] sm:$0xff] }
 0x13b   : > { %v887_v35 = vadd.f32 %v2951_v51, %v886_v49  ;;  %v1104_v20 = vadd.f32 1.0, %v1883_v59  ;;  %v1075_v30 = vmul.f32 %v1074_v8, %v2930_v52  ;;  %vm930_vm2 = vmor %vm928_vm1, %vm929_vm0  ;;  %v935_v9 = vor.u32 1.1754944e-38, %v934_v29  ;;  %v1241_v7 = vld [vmem:[%s2471_s22 + $0x3c8] sm:$0xff] }
 0x13c   : > { %v925_v18 = vsub.f32 1.0, %v924_v54  ;;  %2010 = vrcp.f32 %v3005_v16  ;;  %1332 = vmatpush.msra.mxu3 %v1216_v26  ;;  %v1026_v5 = vmul.f32 %v2957_v25, %v2892_v48  ;;  %v912_v19 = vmul.f32 %v2966_v33, %v2847_v55  ;;  %v1239_v26 = vld [vmem:[%s2471_s22 + $0x3b8] sm:$0xff] }
 0x13d   : > { %v891_v60 = vsel %vm2994_vm15, %v2951_v51, %v887_v35  ;;  %v3012_v14 = vmul.f32 %v1104_v20, %v2933_v43  ;;  %v1037_v51 = vmul.f32 %v1036_v11, %v2892_v48  ;;  %v1209_v43 = vld [vmem:[%s2471_s22 + $0x2c8] sm:$0xff]  ;;  %vm933_vm3 = vcmp.eq.f32.partialorder %v932_v57, 8.507059e+37 }
 0x13e   : > { %v896_v27 = vsel %vm2962_vm12, %v895_v15, %v891_v60  ;;  %v926_v3 = vmul.f32 %v2971_v61, %v925_v18  ;;  %1389 = vmatpush.msrb.mxu2 %v1209_v43  ;;  %v1065_v59 = vadd.f32 0.0036580483, %v1064_v44  ;;  %v1076_v25 = vadd.f32 0.014752088, %v1075_v30  ;;  %v1199_v60 = vld [vmem:[%s2471_s22 + $0x278] sm:$0xff]  ;;  %v1197_v44 = vld [vmem:[%s2471_s22 + $0x268] sm:$0xff] }
 0x13f   : > { %v897_v31 = vmul.f32 %v896_v27, %v872_v32  ;;  %1267 = vmatmul.f32.gmra.mxu0 %v3012_v14  ;;  %v1247_v32 = vld [vmem:[%s2471_s22 + $0x3f8] sm:$0xff]  ;;  %v1038_v28 = vadd.f32 0.112945676, %v1037_v51  ;;  %v1027_v55 = vadd.f32 0.05243302, %v1026_v5  ;;  %v767_v18 = vmul.f32 0.5, %v2835_v47 }
 0x140   : > { %v927_v39 = vadd.f32 %v2971_v61, %v926_v3  ;;  %1409 = vmatpush.msrb.mxu3 %v1247_v32  ;;  %1390 = vmatpush.msrb.mxu2 %v1207_v38  ;;  %v1077_v33 = vmul.f32 %v1076_v25, %v2930_v52  ;;  %v991_v12 = vadd.f32 1.1283791, %v990_v41  ;;  %v1066_v1 = vmul.f32 %v1065_v59, %v2930_v52  ;;  %v1237_v47 = vld [vmem:[%s2471_s22 + $0x3a8] sm:$0xff]  ;;  %v1195_v30 = vld [vmem:[%s2471_s22 + $0x258] sm:$0xff] }
 0x141   : > { %v1881_v49 = vclamps-f32 %v897_v31, 1.0  ;;  %v1039_v35 = vmul.f32 %v1038_v28, %v2892_v48  ;;  %v1028_v8 = vmul.f32 %v1027_v55, %v2892_v48  ;;  %v1012_v27 = vand.u32 2147483647, %v3005_v16  ;;  %v1233_v41 = vld [vmem:[%s2471_s22 + $0x388] sm:$0xff] }
 0x142   : > { %v931_v50 = vsel %vm930_vm2, %v2971_v61, %v927_v39  ;;  %1410 = vmatpush.msrb.mxu3 %v1245_v37  ;;  %v2011_v10 = vpop.eup %2010  ;;  %1391 = vmatpush.msrb.mxu2 %v1205_v56  ;;  %v1078_v15 = vadd.f32 0.112945676, %v1077_v33  ;;  %v1014_v3 = vand.u32 2147483648, %v3005_v16  ;;  %v1067_v43 = vadd.f32 0.05243302, %v1066_v1  ;;  %v1187_v33 = vld [vmem:[%s2471_s22 + $0x218] sm:$0xff] }
 0x143   : > { %v1102_v0 = vadd.f32 1.0, %v1881_v49  ;;  %v936_v54 = vsel %vm933_vm3, %v935_v9, %v931_v50  ;;  %v1004_v57 = vmul.f32 %v2011_v10, %v3005_v16  ;;  %v1040_v11 = vadd.f32 0.4994258, %v1039_v35  ;;  %v1231_v50 = vld [vmem:[%s2471_s22 + $0x378] sm:$0xff]  ;;  %v1185_v1 = vld [vmem:[%s2471_s22 + $0x208] sm:$0xff] }
 0x144   : > { %v937_v6 = vmul.f32 %v936_v54, %v912_v19  ;;  %1411 = vmatpush.msrb.mxu3 %v1243_v13  ;;  %1392 = vmatpush.msrb.mxu2 %v1203_v62  ;;  %vm1009_vm4 = vweird.f32 %v2011_v10  ;;  %vm1008_vm5 = vweird.f32 %v3005_v16  ;;  %v1015_v49 = vor.u32 1.1754944e-38, %v1014_v3  ;;  %v1193_v16 = vld [vmem:[%s2471_s22 + $0x248] sm:$0xff]  ;;  %v1191_v54 = vld [vmem:[%s2471_s22 + $0x238] sm:$0xff] }
 0x145   : > { %v3040_v58 = vmul.f32 %v1102_v0, %v766_v23  ;;  %v1005_v20 = vsub.f32 1.0, %v1004_v57  ;;  %v1041_v42 = vmul.f32 %v1040_v11, %v2892_v48  ;;  %v1235_v23 = vld [vmem:[%s2471_s22 + $0x398] sm:$0xff]  ;;  %vm1010_vm6 = vmor %vm1008_vm5, %vm1009_vm4  ;;  %v992_v5 = vmul.f32 %v991_v12, %v2719_v36  ;;  %v1229_v36 = vld [vmem:[%s2471_s22 + $0x368] sm:$0xff] }
 0x146   : > { %v1882_v61 = vclamps-f32 %v937_v6, 1.0  ;;  %1412 = vmatpush.msrb.mxu3 %v1241_v7  ;;  %1393 = vmatpush.msrb.mxu2 %v1201_v21  ;;  %v1029_v37 = vadd.f32 0.18741608, %v1028_v8  ;;  %vm1013_vm7 = vcmp.eq.f32.partialorder %v1012_v27, 8.507059e+37  ;;  %v1068_v56 = vmul.f32 %v1067_v43, %v2930_v52  ;;  %v1189_v62 = vld [vmem:[%s2471_s22 + $0x228] sm:$0xff]  ;;  %v1227_v7 = vld [vmem:[%s2471_s22 + $0x358] sm:$0xff] }
 0x147   : > { %1356 = vmatmul.f32.vlgmr.msrb.gmra.mxu0 %v2874_v40  ;;  %1310 = vmatmul.f32.vlgmr.msra.gmra.mxu2 %v3040_v58  ;;  %v1079_v40 = vmul.f32 %v1078_v15, %v2930_v52  ;;  %v1006_v31 = vmul.f32 %v2011_v10, %v1005_v20  ;;  %v3061_v39 = vadd.f32 1.0, %v1041_v42  ;;  %v1223_v15 = vld [vmem:[%s2471_s22 + $0x338] sm:$0xff] }
 0x148   : > { %v1103_v29 = vadd.f32 1.0, %v1882_v61  ;;  %1413 = vmatpush.msrb.mxu3 %v1239_v26  ;;  %1394 = vmatpush.msrb.mxu2 %v1199_v60  ;;  %v1030_v25 = vmul.f32 %v1029_v37, %v2892_v48  ;;  %v1069_v35 = vadd.f32 0.18741608, %v1068_v56  ;;  %v1225_v61 = vld [vmem:[%s2471_s22 + $0x348] sm:$0xff]  ;;  %v1219_v27 = vld [vmem:[%s2471_s22 + $0x318] sm:$0xff] }
 0x149   : > { %v1080_v32 = vadd.f32 0.4994258, %v1079_v40  ;;  %v1007_v38 = vadd.f32 %v2011_v10, %v1006_v31  ;;  %2012 = vrcp.f32 %v3061_v39  ;;  %v1054_v12 = vand.u32 2147483648, %v3061_v39  ;;  %v1221_v26 = vld [vmem:[%s2471_s22 + $0x328] sm:$0xff] }
 0x14a   : > { %v3057_v51 = vmul.f32 %v1103_v29, %v767_v18  ;;  %1414 = vmatpush.msrb.mxu3 %v1237_v47  ;;  %1395 = vmatpush.msrb.mxu2 %v1197_v44  ;;  %v1031_v48 = vadd.f32 1.1283791, %v1030_v25  ;;  %v1070_v29 = vmul.f32 %v1069_v35, %v2930_v52  ;;  %vm1048_vm9 = vweird.f32 %v3061_v39 }
 0x14b   : > { %v1081_v9 = vmul.f32 %v1080_v32, %v2930_v52  ;;  %v1011_v19 = vsel %vm1010_vm6, %v2011_v10, %v1007_v38  ;;  %v1055_v52 = vor.u32 1.1754944e-38, %v1054_v12 }
 0x14c   : > { %1333 = vmatmul.f32.vlgmr.msra.gmra.mxu3 %v3057_v51  ;;  %v1016_v13 = vsel %vm1013_vm7, %v1015_v49, %v1011_v19  ;;  %1396 = vmatpush.msrb.mxu2 %v1195_v30  ;;  %v1032_v42 = vmul.f32 %v1031_v48, %v2855_v2  ;;  %v1071_v3 = vadd.f32 1.1283791, %v1070_v29  ;;  %v770_v49 = vmul.f32 0.5, %v2841_v53 }
 0x14d   : > { %1415 = vmatpush.msrb.mxu3 %v1235_v23  ;;  %v3073_v28 = vadd.f32 1.0, %v1081_v9  ;;  %v1017_v0 = vmul.f32 %v1016_v13, %v992_v5 }
 0x14e   : > { %1397 = vmatpush.msrb.mxu2 %v1193_v16  ;;  %v1072_v30 = vmul.f32 %v1071_v3, %v2901_v34 }
 0x14f   : > { %1416 = vmatpush.msrb.mxu3 %v1233_v41  ;;  %1359 = vmatmul.f32.gmra.mxu0 %v3012_v14  ;;  %2014 = vrcp.f32 %v3073_v28  ;;  %v2013_v59 = vpop.eup %2012  ;;  %v1884_v6 = vclamps-f32 %v1017_v0, 1.0  ;;  %v769_v14 = vmul.f32 0.5, %v2710_v24  ;;  %v1052_v24 = vand.u32 2147483647, %v3061_v39 }
 0x150   : > { %v1044_v10 = vmul.f32 %v2013_v59, %v3061_v39  ;;  %1398 = vmatpush.msrb.mxu2 %v1191_v54  ;;  %vm1049_vm8 = vweird.f32 %v2013_v59  ;;  %v1094_v40 = vand.u32 2147483648, %v3073_v28  ;;  %v1092_v23 = vand.u32 2147483647, %v3073_v28  ;;  %v1217_v39 = vld [vmem:[%s2471_s22 + $0x308] sm:$0xff] }
 0x151   : > { %1417 = vmatpush.msrb.mxu3 %v1231_v50  ;;  %v1105_v55 = vadd.f32 1.0, %v1884_v6  ;;  %vm1050_vm10 = vmor %vm1048_vm9, %vm1049_vm8  ;;  %vm1053_vm11 = vcmp.eq.f32.partialorder %v1052_v24, 8.507059e+37  ;;  %vm1088_vm13 = vweird.f32 %v3073_v28  ;;  %v771_v50 = vmul.f32 0.5, %v2881_v45  ;;  %v1116_v54 = vld [vmem:[#allocation2 + $0x10] sm:$0xff] }
 0x152   : > { %v1045_v57 = vsub.f32 1.0, %v1044_v10  ;;  %1399 = vmatpush.msrb.mxu2 %v1189_v62  ;;  %v1095_v38 = vor.u32 1.1754944e-38, %v1094_v40  ;;  %vm1093_vm15 = vcmp.eq.f32.partialorder %v1092_v23, 8.507059e+37  ;;  %v1118_v10 = vld [vmem:[#allocation2 + $0x18] sm:$0xff] }
 0x153   : > { %1418 = vmatpush.msrb.mxu3 %v1229_v36  ;;  %v1113_v11 = vmul.f32 %v1105_v55, %v769_v14 }
 0x154   : > { %v1046_v20 = vmul.f32 %v2013_v59, %v1045_v57  ;;  %1400 = vmatpush.msrb.mxu2 %v1187_v33 }
 0x155   : > { %1419 = vmatpush.msrb.mxu3 %v1227_v7  ;;  %v2015_v18 = vpop.eup %2014  ;;  %1290 = vmatmul.f32.gmra.mxu1 %v1113_v11 }
 0x156   : > { %v1084_v21 = vmul.f32 %v2015_v18, %v3073_v28  ;;  %v1047_v60 = vadd.f32 %v2013_v59, %v1046_v20  ;;  %1401 = vmatpush.msrb.mxu2 %v1185_v1  ;;  %vm1089_vm12 = vweird.f32 %v2015_v18 }
 0x157   : > { %1420 = vmatpush.msrb.mxu3 %v1225_v61  ;;  %vm1090_vm14 = vmor %vm1088_vm13, %vm1089_vm12 }
 0x158   : > { %v1085_v8 = vsub.f32 1.0, %v1084_v21  ;;  %v1051_v47 = vsel %vm1050_vm10, %v2013_v59, %v1047_v60 }
 0x159   : > { %1421 = vmatpush.msrb.mxu3 %v1223_v15  ;;  %v1056_v31 = vsel %vm1053_vm11, %v1055_v52, %v1051_v47 }
 0x15a   : > { %v1086_v44 = vmul.f32 %v2015_v18, %v1085_v8  ;;  %v1057_v43 = vmul.f32 %v1056_v31, %v1032_v42 }
 0x15b   : > { %1422 = vmatpush.msrb.mxu3 %v1221_v26  ;;  %v1119_v26 = vld [vmem:[#allocation2 + $0x8] sm:$0xff] }
 0x15c   : > { %v1087_v32 = vadd.f32 %v2015_v18, %v1086_v44  ;;  %v1885_v2 = vclamps-f32 %v1057_v43, 1.0 }
 0x15d   : > { %1423 = vmatpush.msrb.mxu3 %v1219_v27  ;;  %1379 = vmatmul.f32.vlgmr.msrb.gmra.mxu1 %v2908_v46 }
 0x15e   : > { %v1091_v41 = vsel %vm1090_vm14, %v2015_v18, %v1087_v32  ;;  %v1106_v9 = vadd.f32 1.0, %v1885_v2 }
 0x15f   : > { %1424 = vmatpush.msrb.mxu3 %v1217_v39  ;;  %v1096_v5 = vsel %vm1093_vm15, %v1095_v38, %v1091_v41 }
 0x160   : > { %v1097_v37 = vmul.f32 %v1096_v5, %v1072_v30  ;;  %v1114_v19 = vmul.f32 %v1106_v9, %v770_v49 }
 0x162   : > { %v1886_v16 = vclamps-f32 %v1097_v37, 1.0  ;;  %1313 = vmatmul.f32.gmra.mxu2 %v1114_v19 }
 0x164   : > { %v1107_v56 = vadd.f32 1.0, %v1886_v16 }
 0x165   : > { %1382 = vmatmul.f32.gmra.mxu1 %v1113_v11  ;;  %v1117_v11 = vld [vmem:[#allocation2] sm:$0xff] }
 0x166   : > { %v1115_v13 = vmul.f32 %v1107_v56, %v771_v50 }
 0x168   : > { %1336 = vmatmul.f32.gmra.mxu3 %v1115_v13 }
 0x16a   : > { %1402 = vmatmul.f32.vlgmr.msrb.gmra.mxu2 %v3040_v58 }
 0x170   : > { %1425 = vmatmul.f32.vlgmr.msrb.gmra.mxu3 %v3057_v51 }
 0x172   : > { %1405 = vmatmul.f32.gmra.mxu2 %v1114_v19 }
 0x178   : > { %1428 = vmatmul.f32.gmra.mxu3 %v1115_v13 }
 0x1a0   : > { %v1265_v53 = vpop.f32.mrf.mxu0 }
 0x1a7   : > { %v1288_v34 = vpop.f32.mrf.mxu1 }
 0x1a8   : > { %v1289_v28 = vadd.f32 %v1288_v34, %v1265_v53 }
 0x1bc   : > { %v1268_v6 = vpop.f32.mrf.mxu0 }
 0x1c4   : > { %v1357_v55 = vpop.f32.mrf.mxu0 }
 0x1ca   : > { %v1311_v46 = vpop.f32.mrf.mxu2 }
 0x1cb   : > { %v1312_v0 = vadd.f32 %v1311_v46, %v1289_v28 }
 0x1cc   : > { %v1360_v29 = vpop.f32.mrf.mxu0 }
 0x1cf   : > { %v1334_v36 = vpop.f32.mrf.mxu3 }
 0x1d0   : > { %v1335_v59 = vadd.f32 %v1334_v36, %v1312_v0 }
 0x1d2   : > { %v1432_v25 = vadd.f32 %v1335_v59, %v1116_v54  ;;  %v1291_v45 = vpop.f32.mrf.mxu1 }
 0x1d3   : > { %v1292_v7 = vadd.f32 %v1291_v45, %v1268_v6 }
 0x1d4   : > { %1436 = vst [vmem:[#allocation2 + $0x10] sm:$0xff] %v1432_v25 }
 0x1da   : > { %v1380_v58 = vpop.f32.mrf.mxu1 }
 0x1db   : > { %v1381_v57 = vadd.f32 %v1380_v58, %v1357_v55 }
 0x1e2   : > { %v1383_v15 = vpop.f32.mrf.mxu1 }
 0x1e3   : > { %v1384_v24 = vadd.f32 %v1383_v15, %v1360_v29 }
 0x1e5   : > { %v1314_v62 = vpop.f32.mrf.mxu2 }
 0x1e6   : > { %v1315_v35 = vadd.f32 %v1314_v62, %v1292_v7 }
 0x1eb   : > { %v1337_v51 = vpop.f32.mrf.mxu3 }
 0x1ec   : > { %v1338_v14 = vadd.f32 %v1337_v51, %v1315_v35 }
 0x1ed   : > { %v1403_v61 = vpop.f32.mrf.mxu2 }
 0x1ee   : > { %v1434_v33 = vadd.f32 %v1338_v14, %v1118_v10  ;;  %v1404_v48 = vadd.f32 %v1403_v61, %v1381_v57 }
 0x1f0   : > { %1438 = vst [vmem:[#allocation2 + $0x18] sm:$0xff] %v1434_v33 }
 0x1f3   : > { %v1426_v12 = vpop.f32.mrf.mxu3 }
 0x1f4   : > { %v1427_v1 = vadd.f32 %v1426_v12, %v1404_v48 }
 0x1f5   : > { %v1406_v20 = vpop.f32.mrf.mxu2 }
 0x1f6   : > { %v1433_v18 = vadd.f32 %v1427_v1, %v1117_v11  ;;  %v1407_v21 = vadd.f32 %v1406_v20, %v1384_v24 }
 0x1f8   : > { %1437 = vst [vmem:[#allocation2] sm:$0xff] %v1433_v18 }
 0x1fb   : > { %v1429_v60 = vpop.f32.mrf.mxu3 }
 0x1fc   : > { %v1430_v42 = vadd.f32 %v1429_v60, %v1407_v21  ;;  %1443 = sbr.rel (%p1887_p1) target bundleno = 724 (0x2d4), region = 76 }
 0x1fe   : > { %v1435_v52 = vadd.f32 %v1430_v42, %v1119_v26 }
 0x200   : > { %1439 = vst [vmem:[#allocation2 + $0x8] sm:$0xff] %v1435_v52 }
 0x201   : > { %v1488_v8 = vld [vmem:[#allocation11 + $0xf0] sm:$0xff]  ;;  %v1489_v27 = vld [vmem:[#allocation11 + $0xf8] sm:$0xff]  ;;  %v1486_v3 = vld [vmem:[#allocation11 + $0xe0] sm:$0xff] }
 0x202   : > { %1528 = vmatpush.msra.mxu0 %v1488_v8  ;;  %1574 = vmatpush.msra.mxu2 %v1489_v27  ;;  %v1520_v47 = vld [vmem:[#allocation11 + $0x1f0] sm:$0xff]  ;;  %v1487_v40 = vld [vmem:[#allocation11 + $0xe8] sm:$0xff]  ;;  %v1521_v31 = vld [vmem:[#allocation11 + $0x1f8] sm:$0xff] }
 0x203   : > { %1551 = vmatpush.msra.mxu1 %v1520_v47  ;;  %1597 = vmatpush.msra.mxu3 %v1521_v31  ;;  %v1484_v44 = vld [vmem:[#allocation11 + $0xd0] sm:$0xff]  ;;  %v1518_v23 = vld [vmem:[#allocation11 + $0x1e0] sm:$0xff]  ;;  %v1485_v39 = vld [vmem:[#allocation11 + $0xd8] sm:$0xff] }
 0x204   : > { %1529 = vmatpush.msra.mxu0 %v1486_v3  ;;  %1575 = vmatpush.msra.mxu2 %v1487_v40  ;;  %v1519_v43 = vld [vmem:[#allocation11 + $0x1e8] sm:$0xff]  ;;  %v1516_v32 = vld [vmem:[#allocation11 + $0x1d0] sm:$0xff]  ;;  %v1482_v2 = vld [vmem:[#allocation11 + $0xc0] sm:$0xff] }
 0x205   : > { %1552 = vmatpush.msra.mxu1 %v1518_v23  ;;  %1598 = vmatpush.msra.mxu3 %v1519_v43  ;;  %v1483_v38 = vld [vmem:[#allocation11 + $0xc8] sm:$0xff]  ;;  %v1517_v30 = vld [vmem:[#allocation11 + $0x1d8] sm:$0xff]  ;;  %v1514_v41 = vld [vmem:[#allocation11 + $0x1c0] sm:$0xff] }
 0x206   : > { %1530 = vmatpush.msra.mxu0 %v1484_v44  ;;  %1576 = vmatpush.msra.mxu2 %v1485_v39  ;;  %v1515_v49 = vld [vmem:[#allocation11 + $0x1c8] sm:$0xff]  ;;  %v1480_v9 = vld [vmem:[#allocation11 + $0xb0] sm:$0xff]  ;;  %v1481_v5 = vld [vmem:[#allocation11 + $0xb8] sm:$0xff] }
 0x207   : > { %1553 = vmatpush.msra.mxu1 %v1516_v32  ;;  %1599 = vmatpush.msra.mxu3 %v1517_v30  ;;  %v1512_v37 = vld [vmem:[#allocation11 + $0x1b0] sm:$0xff]  ;;  %v1513_v19 = vld [vmem:[#allocation11 + $0x1b8] sm:$0xff]  ;;  %v1478_v16 = vld [vmem:[#allocation11 + $0xa0] sm:$0xff] }
 0x208   : > { %1531 = vmatpush.msra.mxu0 %v1482_v2  ;;  %1577 = vmatpush.msra.mxu2 %v1483_v38  ;;  %v1479_v50 = vld [vmem:[#allocation11 + $0xa8] sm:$0xff]  ;;  %v1510_v56 = vld [vmem:[#allocation11 + $0x1a0] sm:$0xff]  ;;  %v1476_v34 = vld [vmem:[#allocation11 + $0x90] sm:$0xff] }
 0x209   : > { %1554 = vmatpush.msra.mxu1 %v1514_v41  ;;  %1600 = vmatpush.msra.mxu3 %v1515_v49  ;;  %v1511_v13 = vld [vmem:[#allocation11 + $0x1a8] sm:$0xff]  ;;  %v1477_v53 = vld [vmem:[#allocation11 + $0x98] sm:$0xff]  ;;  %v1508_v46 = vld [vmem:[#allocation11 + $0x190] sm:$0xff] }
 0x20a   : > { %1532 = vmatpush.msra.mxu0 %v1480_v9  ;;  %1578 = vmatpush.msra.mxu2 %v1481_v5  ;;  %v1509_v28 = vld [vmem:[#allocation11 + $0x198] sm:$0xff]  ;;  %v1474_v0 = vld [vmem:[#allocation11 + $0x80] sm:$0xff]  ;;  %v1475_v54 = vld [vmem:[#allocation11 + $0x88] sm:$0xff] }
 0x20b   : > { %1555 = vmatpush.msra.mxu1 %v1512_v37  ;;  %1601 = vmatpush.msra.mxu3 %v1513_v19  ;;  %v1506_v36 = vld [vmem:[#allocation11 + $0x180] sm:$0xff]  ;;  %v1507_v59 = vld [vmem:[#allocation11 + $0x188] sm:$0xff]  ;;  %v1472_v25 = vld [vmem:[#allocation11 + $0x70] sm:$0xff] }
 0x20c   : > { %1533 = vmatpush.msra.mxu0 %v1478_v16  ;;  %1579 = vmatpush.msra.mxu2 %v1479_v50  ;;  %v1473_v45 = vld [vmem:[#allocation11 + $0x78] sm:$0xff]  ;;  %v1504_v6 = vld [vmem:[#allocation11 + $0x170] sm:$0xff]  ;;  %v1470_v7 = vld [vmem:[#allocation11 + $0x60] sm:$0xff] }
 0x20d   : > { %1556 = vmatpush.msra.mxu1 %v1510_v56  ;;  %1602 = vmatpush.msra.mxu3 %v1511_v13  ;;  %v1505_v62 = vld [vmem:[#allocation11 + $0x178] sm:$0xff]  ;;  %v1471_v35 = vld [vmem:[#allocation11 + $0x68] sm:$0xff]  ;;  %v1502_v58 = vld [vmem:[#allocation11 + $0x160] sm:$0xff] }
 0x20e   : > { %1534 = vmatpush.msra.mxu0 %v1476_v34  ;;  %1580 = vmatpush.msra.mxu2 %v1477_v53  ;;  %v1503_v10 = vld [vmem:[#allocation11 + $0x168] sm:$0xff]  ;;  %v1468_v51 = vld [vmem:[#allocation11 + $0x50] sm:$0xff]  ;;  %v1469_v14 = vld [vmem:[#allocation11 + $0x58] sm:$0xff] }
 0x20f   : > { %1557 = vmatpush.msra.mxu1 %v1508_v46  ;;  %1603 = vmatpush.msra.mxu3 %v1509_v28  ;;  %v1500_v55 = vld [vmem:[#allocation11 + $0x150] sm:$0xff]  ;;  %v1501_v33 = vld [vmem:[#allocation11 + $0x158] sm:$0xff]  ;;  %v1466_v61 = vld [vmem:[#allocation11 + $0x40] sm:$0xff] }
 0x210   : > { %1535 = vmatpush.msra.mxu0 %v1474_v0  ;;  %1581 = vmatpush.msra.mxu2 %v1475_v54  ;;  %v1467_v57 = vld [vmem:[#allocation11 + $0x48] sm:$0xff]  ;;  %v1498_v48 = vld [vmem:[#allocation11 + $0x140] sm:$0xff]  ;;  %v1464_v12 = vld [vmem:[#allocation11 + $0x30] sm:$0xff] }
 0x211   : > { %1558 = vmatpush.msra.mxu1 %v1506_v36  ;;  %1604 = vmatpush.msra.mxu3 %v1507_v59  ;;  %v1499_v11 = vld [vmem:[#allocation11 + $0x148] sm:$0xff]  ;;  %v1465_v1 = vld [vmem:[#allocation11 + $0x38] sm:$0xff]  ;;  %v1496_v15 = vld [vmem:[#allocation11 + $0x130] sm:$0xff] }
 0x212   : > { %1536 = vmatpush.msra.mxu0 %v1472_v25  ;;  %1582 = vmatpush.msra.mxu2 %v1473_v45  ;;  %v1497_v18 = vld [vmem:[#allocation11 + $0x138] sm:$0xff]  ;;  %v1462_v29 = vld [vmem:[#allocation11 + $0x20] sm:$0xff]  ;;  %v1463_v20 = vld [vmem:[#allocation11 + $0x28] sm:$0xff] }
 0x213   : > { %1559 = vmatpush.msra.mxu1 %v1504_v6  ;;  %1605 = vmatpush.msra.mxu3 %v1505_v62  ;;  %v1494_v24 = vld [vmem:[#allocation11 + $0x120] sm:$0xff]  ;;  %v1495_v21 = vld [vmem:[#allocation11 + $0x128] sm:$0xff]  ;;  %v1460_v26 = vld [vmem:[#allocation11 + $0x10] sm:$0xff] }
 0x214   : > { %1537 = vmatpush.msra.mxu0 %v1470_v7  ;;  %1583 = vmatpush.msra.mxu2 %v1471_v35  ;;  %v1461_v60 = vld [vmem:[#allocation11 + $0x18] sm:$0xff]  ;;  %v1492_v42 = vld [vmem:[#allocation11 + $0x110] sm:$0xff]  ;;  %v1458_v8 = vld [vmem:[#allocation11] sm:$0xff] }
 0x215   : > { %1560 = vmatpush.msra.mxu1 %v1502_v58  ;;  %1606 = vmatpush.msra.mxu3 %v1503_v10  ;;  %v1493_v52 = vld [vmem:[#allocation11 + $0x118] sm:$0xff]  ;;  %v1459_v27 = vld [vmem:[#allocation11 + $0x8] sm:$0xff]  ;;  %v1490_v3 = vld [vmem:[#allocation11 + $0x100] sm:$0xff] }
 0x216   : > { %1538 = vmatpush.msra.mxu0 %v1468_v51  ;;  %1584 = vmatpush.msra.mxu2 %v1469_v14  ;;  %v1491_v47 = vld [vmem:[#allocation11 + $0x108] sm:$0xff]  ;;  %v1522_v40 = vld [vmem:[%s3164_s6] sm:$0x3] }
 0x217   : > { %1561 = vmatpush.msra.mxu1 %v1500_v55  ;;  %1607 = vmatpush.msra.mxu3 %v1501_v33  ;;  %v1524_v31 = vperm.slane %v1522_v40, 0  ;;  %v1525_v32 = vperm.slane %v1522_v40, 1  ;;  %v3121_v45 = vld [vmem:[%s3200_s18] sm:$0x3]  ;;  %v1444_v33 = vld [vmem:[#allocation2 + $0x10] sm:$0xff] }
 0x218   : > { %1539 = vmatpush.msra.mxu0 %v1466_v61  ;;  %1585 = vmatpush.msra.mxu2 %v1467_v57  ;;  %v1450_v35 = vperm.slane %v3121_v45, 0 }
 0x219   : > { %1562 = vmatpush.msra.mxu1 %v1498_v48  ;;  %1608 = vmatpush.msra.mxu3 %v1499_v11 }
 0x21a   : > { %1540 = vmatpush.msra.mxu0 %v1464_v12  ;;  %1586 = vmatpush.msra.mxu2 %v1465_v1  ;;  %v1451_v12 = vperm.slane %v3121_v45, 1 }
 0x21b   : > { %1563 = vmatpush.msra.mxu1 %v1496_v15  ;;  %1609 = vmatpush.msra.mxu3 %v1497_v18  ;;  %v1454_v15 = vadd.f32 %v1450_v35, %v1444_v33 }
 0x21c   : > { %1541 = vmatpush.msra.mxu0 %v1462_v29  ;;  %1587 = vmatpush.msra.mxu2 %v1463_v20  ;;  %v1445_v29 = vld [vmem:[#allocation2] sm:$0xff] }
 0x21d   : > { %1564 = vmatpush.msra.mxu1 %v1494_v24  ;;  %1610 = vmatpush.msra.mxu3 %v1495_v21 }
 0x21e   : > { %1542 = vmatpush.msra.mxu0 %v1460_v26  ;;  %1588 = vmatpush.msra.mxu2 %v1461_v60 }
 0x21f   : > { %1565 = vmatpush.msra.mxu1 %v1492_v42  ;;  %1611 = vmatpush.msra.mxu3 %v1493_v52 }
 0x220   : > { %1543 = vmatpush.msra.mxu0 %v1458_v8  ;;  %1589 = vmatpush.msra.mxu2 %v1459_v27  ;;  %v1455_v8 = vadd.f32 %v1451_v12, %v1445_v29 }
 0x221   : > { %1544 = vmatmul.f32.vlgmr.msra.gmra.mxu0 %v2544_v63  ;;  %1590 = vmatmul.f32.vlgmr.msra.gmra.mxu2 %v2544_v63 }
 0x222   : > { %1566 = vmatpush.msra.mxu1 %v1490_v3  ;;  %1612 = vmatpush.msra.mxu3 %v1491_v47 }
 0x223   : > { %1567 = vmatmul.f32.vlgmr.msra.gmra.mxu1 %v2552_v4  ;;  %1613 = vmatmul.f32.vlgmr.msra.gmra.mxu3 %v2552_v4 }
 0x229   : > { %1547 = vmatmul.f32.gmra.mxu0 %v2568_v17  ;;  %1593 = vmatmul.f32.gmra.mxu2 %v2568_v17 }
 0x22b   : > { %1570 = vmatmul.f32.gmra.mxu1 %v2576_v22  ;;  %1616 = vmatmul.f32.gmra.mxu3 %v2576_v22 }
 0x29e   : > { %v1545_v44 = vpop.f32.mrf.mxu0 }
 0x29f   : > { %v1546_v23 = vadd.f32 %v1545_v44, %v1524_v31  ;;  %v1446_v44 = vld [vmem:[#allocation2 + $0x18] sm:$0xff] }
 0x2a0   : > { %v1568_v39 = vpop.f32.mrf.mxu1 }
 0x2a1   : > { %v1569_v43 = vadd.f32 %v1568_v39, %v1546_v23 }
 0x2a3   : > { %v1888_v2 = vmul.f32 -1.442695, %v1569_v43 }
 0x2a4   : > { %v1591_v38 = vpop.f32.mrf.mxu2 }
 0x2a5   : > { %2016 = vpow2.f32 %v1888_v2  ;;  %v1592_v30 = vadd.f32 %v1591_v38, %v1525_v32 }
 0x2a6   : > { %v1548_v41 = vpop.f32.mrf.mxu0  ;;  %v1614_v49 = vpop.f32.mrf.mxu3 }
 0x2a7   : > { %v1549_v9 = vadd.f32 %v1548_v41, %v1524_v31  ;;  %v1615_v5 = vadd.f32 %v1614_v49, %v1592_v30  ;;  %v1456_v49 = vadd.f32 %v1450_v35, %v1446_v44 }
 0x2a8   : > { %v1571_v37 = vpop.f32.mrf.mxu1 }
 0x2a9   : > { %v1889_v19 = vmul.f32 -1.442695, %v1615_v5  ;;  %v1572_v16 = vadd.f32 %v1571_v37, %v1549_v9 }
 0x2ab   : > { %v2017_v50 = vpop.eup %2016  ;;  %2018 = vpow2.f32 %v1889_v19  ;;  %v1890_v56 = vmul.f32 -1.442695, %v1572_v16 }
 0x2ac   : > { %v1632_v13 = vadd.f32 1.0, %v2017_v50  ;;  %v1594_v34 = vpop.f32.mrf.mxu2 }
 0x2ad   : > { %2020 = vpow2.f32 %v1890_v56  ;;  %v1595_v53 = vadd.f32 %v1594_v34, %v1525_v32 }
 0x2ae   : > { %2022 = vrcp.f32 %v1632_v13  ;;  %v1617_v46 = vpop.f32.mrf.mxu3  ;;  %v1647_v58 = vand.u32 2147483648, %v1632_v13  ;;  %vm1641_vm0 = vweird.f32 %v1632_v13  ;;  %v1645_v14 = vand.u32 2147483647, %v1632_v13 }
 0x2af   : > { %v1618_v28 = vadd.f32 %v1617_v46, %v1595_v53 }
 0x2b0   : > { %v1648_v11 = vor.u32 1.1754944e-38, %v1647_v58  ;;  %vm1646_vm3 = vcmp.eq.f32.partialorder %v1645_v14, 8.507059e+37 }
 0x2b1   : > { %v2019_v0 = vpop.eup %2018  ;;  %v1891_v54 = vmul.f32 -1.442695, %v1618_v28  ;;  %v1447_v28 = vld [vmem:[#allocation2 + $0x8] sm:$0xff] }
 0x2b2   : > { %v1633_v36 = vadd.f32 1.0, %v2019_v0  ;;  %v1457_v45 = vadd.f32 %v1451_v12, %v1447_v28 }
 0x2b3   : > { %v2021_v59 = vpop.eup %2020  ;;  %2024 = vpow2.f32 %v1891_v54 }
 0x2b4   : > { %v2023_v25 = vpop.eup %2022  ;;  %2026 = vrcp.f32 %v1633_v36  ;;  %v1634_v62 = vadd.f32 1.0, %v2021_v59  ;;  %v1662_v21 = vand.u32 2147483648, %v1633_v36  ;;  %v1660_v52 = vand.u32 2147483647, %v1633_v36 }
 0x2b5   : > { %v1637_v6 = vmul.f32 %v2023_v25, %v1632_v13  ;;  %vm1642_vm1 = vweird.f32 %v2023_v25  ;;  %vm1656_vm5 = vweird.f32 %v1633_v36 }
 0x2b6   : > { %2028 = vrcp.f32 %v1634_v62  ;;  %vm1643_vm2 = vmor %vm1641_vm0, %vm1642_vm1  ;;  %v1675_v3 = vand.u32 2147483647, %v1634_v62  ;;  %v1677_v23 = vand.u32 2147483648, %v1634_v62  ;;  %v1663_v43 = vor.u32 1.1754944e-38, %v1662_v21 }
 0x2b7   : > { %v1638_v7 = vsub.f32 1.0, %v1637_v6  ;;  %vm1671_vm7 = vweird.f32 %v1634_v62  ;;  %vm1661_vm9 = vcmp.eq.f32.partialorder %v1660_v52, 8.507059e+37 }
 0x2b8   : > { %vm1676_vm11 = vcmp.eq.f32.partialorder %v1675_v3, 8.507059e+37 }
 0x2b9   : > { %v2025_v10 = vpop.eup %2024  ;;  %v1639_v51 = vmul.f32 %v2023_v25, %v1638_v7 }
 0x2ba   : > { %v2027_v55 = vpop.eup %2026  ;;  %v3124_v61 = vadd.f32 1.0, %v2025_v10 }
 0x2bb   : > { %v1640_v57 = vadd.f32 %v2023_v25, %v1639_v51  ;;  %v1652_v48 = vmul.f32 %v2027_v55, %v1633_v36  ;;  %vm1657_vm4 = vweird.f32 %v2027_v55 }
 0x2bc   : > { %2030 = vrcp.f32 %v3124_v61  ;;  %v2029_v1 = vpop.eup %2028  ;;  %vm1658_vm6 = vmor %vm1656_vm5, %vm1657_vm4  ;;  %v1690_v16 = vand.u32 2147483647, %v3124_v61  ;;  %v1692_v50 = vand.u32 2147483648, %v3124_v61  ;;  %vm1686_vm13 = vweird.f32 %v3124_v61 }
 0x2bd   : > { %v1644_v18 = vsel %vm1643_vm2, %v2023_v25, %v1640_v57  ;;  %v1653_v20 = vsub.f32 1.0, %v1652_v48  ;;  %v1667_v26 = vmul.f32 %v2029_v1, %v1634_v62  ;;  %vm1672_vm8 = vweird.f32 %v2029_v1 }
 0x2be   : > { %v1649_v24 = vsel %vm1646_vm3, %v1648_v11, %v1644_v18  ;;  %vm1673_vm10 = vmor %vm1671_vm7, %vm1672_vm8  ;;  %v1693_v25 = vor.u32 1.1754944e-38, %v1692_v50  ;;  %vm1691_vm15 = vcmp.eq.f32.partialorder %v1690_v16, 8.507059e+37 }
 0x2bf   : > { %v1700_v60 = vsub.f32 1.0, %v1649_v24  ;;  %v1654_v42 = vmul.f32 %v2027_v55, %v1653_v20  ;;  %v1668_v27 = vsub.f32 1.0, %v1667_v26  ;;  %v1696_v47 = vmul.f32 %v1649_v24, %v1454_v15 }
 0x2c1   : > { %v1704_v40 = vmul.f32 %v1700_v60, %v2544_v63  ;;  %v1655_v31 = vadd.f32 %v2027_v55, %v1654_v42  ;;  %v1669_v32 = vmul.f32 %v2029_v1, %v1668_v27  ;;  %v1678_v63 = vor.u32 1.1754944e-38, %v1677_v23 }
 0x2c2   : > { %v2031_v39 = vpop.eup %2030 }
 0x2c3   : > { %v1708_v2 = vadd.f32 %v1704_v40, %v1696_v47  ;;  %v1659_v38 = vsel %vm1658_vm6, %v2027_v55, %v1655_v31  ;;  %v1682_v30 = vmul.f32 %v2031_v39, %v3124_v61  ;;  %v1670_v9 = vadd.f32 %v2029_v1, %v1669_v32 }
 0x2c4   : > { %v1664_v41 = vsel %vm1661_vm9, %v1663_v43, %v1659_v38  ;;  %vm1687_vm12 = vweird.f32 %v2031_v39 }
 0x2c5   : > { %1712 = vst [vmem:[#allocation12] sm:$0xff] %v1708_v2  ;;  %v1701_v5 = vsub.f32 1.0, %v1664_v41  ;;  %v1683_v37 = vsub.f32 1.0, %v1682_v30  ;;  %v1674_v19 = vsel %vm1673_vm10, %v2029_v1, %v1670_v9  ;;  %v1697_v56 = vmul.f32 %v1664_v41, %v1455_v8  ;;  %vm1688_vm14 = vmor %vm1686_vm13, %vm1687_vm12 }
 0x2c6   : > { %v1679_v34 = vsel %vm1676_vm11, %v1678_v63, %v1674_v19 }
 0x2c7   : > { %v1705_v13 = vmul.f32 %v1701_v5, %v2552_v4  ;;  %v1684_v53 = vmul.f32 %v2031_v39, %v1683_v37  ;;  %v1702_v46 = vsub.f32 1.0, %v1679_v34  ;;  %v1698_v36 = vmul.f32 %v1679_v34, %v1456_v49 }
 0x2c9   : > { %v1709_v0 = vadd.f32 %v1705_v13, %v1697_v56  ;;  %v1685_v54 = vadd.f32 %v2031_v39, %v1684_v53  ;;  %v1706_v59 = vmul.f32 %v1702_v46, %v2568_v17 }
 0x2cb   : > { %1713 = vst [vmem:[#allocation12 + $0x8] sm:$0xff] %v1709_v0  ;;  %v1689_v6 = vsel %vm1688_vm14, %v2031_v39, %v1685_v54  ;;  %v1710_v62 = vadd.f32 %v1706_v59, %v1698_v36 }
 0x2cc   : > { %v1694_v7 = vsel %vm1691_vm15, %v1693_v25, %v1689_v6 }
 0x2cd   : > { %v1703_v4 = vsub.f32 1.0, %v1694_v7  ;;  %1714 = vst [vmem:[#allocation12 + $0x10] sm:$0xff] %v1710_v62  ;;  %v1699_v35 = vmul.f32 %v1694_v7, %v1457_v45 }
 0x2cf   : > { %v1707_v58 = vmul.f32 %v1703_v4, %v2576_v22 }
 0x2d1   : > { %v1711_v10 = vadd.f32 %v1707_v58, %v1699_v35 }
 0x2d3   : > { %1715 = vst [vmem:[#allocation12 + $0x18] sm:$0xff] %v1711_v10 }
 0x2d4 PF: > { %p1939_p3 = scmp.eq.s32.totalorder %s2358_s30, 1  ;;  %s3201_s1 = sld [smem:[#allocation25_spill]] }
 0x2d5   : > { %s2286_s15 = smov [#allocation12]   ;;  %s2287_s14 = smov 256  }
 0x2d6   : > { %s1725_s24 = sshll.u32 %s2286_s15, 4  ;;  %s2288_s10 = smov 16   ;;  %s1726_s24 = int_to_ptr.vmem [resolvable:$true] %s1725_s24 }
 0x2da   : > { %s1727_s23 = sshll.u32 %s3201_s1, 4  ;;  %s1728_s23 = int_to_ptr.hbm [resolvable:$true] %s1727_s23 }
 0x2db   : > { %1914 = dma.vmem_to_hbm [thread:$0]  (%p1939_p3), %s1726_s24, 512, %s1728_s23, [#allocation5], %s2287_s14, %s2287_s14, %s2288_s10  }
 0x2dc   : > { %2251 = dma.done.wait (%p1939_p3), [#allocation5], 512  }
 0x2dd   : > { %2253 = vsyncadd (%p1939_p3), [#allocation5], 4294966784 }
 0x2de PF: > { %s25_s29 = sadd.s32 1, %s2276_s29   ;;  %s3202_s4 = sld [smem:[#allocation18_spill]] }
 0x2df   : > { %p22_p4 = scmp.ge.s32.totalorder %s25_s29, 4   ;;  %s3203_s26 = sld [smem:[#allocation20_spill]] }
 0x2e0   : > { %s3204_s30 = sld [smem:[#allocation19_spill]]  ;;  %s3205_s24 = smov %s2260_s25 }
 0x2e1   : > { %s3207_s27 = smov %s2272_s28 }
 0x2e2   :  { %24 = sbr.rel (!%p22_p4) target bundleno = 14 (0xe), region = 128 }
 0x2e4   : > { %s3206_s25 = smov %s3202_s4 }
 0x2e6   : > { %s3208_s28 = smov %s3204_s30 }
 0x2e7   :  { %1744 = vsyncpa [#allocation4], 1 }
 0x2e8   :  { %1746 = vsyncpa [#allocation4 + $0x1], 1 }
 0x2e9   :  { %1747 = vsyncpa [#allocation7], 1 }
 0x2ea   :  { %1749 = vsyncpa [#allocation7 + $0x1], 1 }
 0x2eb   :  { %1750 = vsyncpa [#allocation10], 1 }
 0x2ec   :  { %1752 = vsyncpa [#allocation10 + $0x1], 1 }
 0x2ed   :  { %1753 = vsyncpa [#allocation5], 1 }
 0x2ee   :  { %1755 = vsyncpa [#allocation5 + $0x1], 1 }

</bundles_post_ra>
